<compile_context>
chip_gen: v6e
topology: v6e:2x2x1
jax: 0.10.0
libtpu: 0.0.40
codegen_flags: <defaults>
</compile_context>

<pallas_src>
import math

import jax
import jax.numpy as jnp
from jax import lax
from jax.experimental import pallas as pl
from jax.experimental.pallas import tpu as pltpu


_SQRT_2_OVER_PI = math.sqrt(2.0 / math.pi)


def _gelu_tanh(x):
    # TODO(synk): PyTorch nn.GELU() default is the exact erf form; the tanh
    # approximation (<1e-3 abs difference) is used since it lowers cleanly to
    # the TPU EUP (tanh). The reference below uses the same form.
    return 0.5 * x * (1.0 + jnp.tanh(_SQRT_2_OVER_PI * (x + 0.044715 * x * x * x)))


# ---------------------------------------------------------------------------
# Fused Mlp kernel: fc1 -> depthwise 3x3 conv -> GELU -> fc2, one row strip per
# grid step.  Grid = (B, H // th).
# ---------------------------------------------------------------------------
def _mlp_fused_kernel(x_ref, w1_ref, b1_ref, wc_ref, bc_ref, w2_ref, b2_ref,
                      o_ref, hpad_ref):
    # x_ref   : (1, H, W, C_in)   input image, resident across the strip axis
    # w1_ref  : (C_hid, C_in)     fc1 weight (PyTorch layout, trans_b contraction)
    # b1_ref  : (1, C_hid)
    # wc_ref  : (9, C_hid)        depthwise taps, (kh, kw) row-major
    # bc_ref  : (1, C_hid)
    # w2_ref  : (C_out, C_hid)    fc2 weight (PyTorch layout)
    # b2_ref  : (1, C_out)
    # o_ref   : (1, th*W, C_out)  output strip of the (B, N, C_out) result
    # hpad_ref: (th+2, W, C_hid)  f32 scratch: H-haloed fc1 output of the strip
    i = pl.program_id(1)
    n_strips = pl.num_programs(1)
    _, H, W, C_in = x_ref.shape
    C_hid = w1_ref.shape[0]
    th = hpad_ref.shape[0] - 2
    h0 = pl.multiple_of(i * th, th)

    w1 = w1_ref[...]                     # loaded once per step (resident block)
    b1 = b1_ref[...]                     # (1, C_hid)

    def fc1_rows(rows):                  # (R, W, C_in) -> (R, W, C_hid) f32
        R = rows.shape[0]
        h = lax.dot_general(
            rows.reshape(R * W, C_in).astype(jnp.float32), w1,
            (((1,), (1,)), ((), ())),    # contract C_in with w1's last dim (trans_b)
            preferred_element_type=jnp.float32)
        return (h + b1).reshape(R, W, C_hid)

    # fc1 of the strip's interior rows goes straight into the haloed scratch:
    # the matmul itself is the "pad fill" (no redundant copy).
    hpad_ref[pl.ds(1, th)] = fc1_rows(x_ref[0, pl.ds(h0, th)])

    # Halo rows: recompute fc1 on the single neighbour row (2/th overhead);
    # zero-pad at the image boundary (conv padding = 1).
    zero_row = jnp.zeros((1, W, C_hid), jnp.float32)

    @pl.when(i == 0)
    def _():
        hpad_ref[pl.ds(0, 1)] = zero_row

    @pl.when(i > 0)
    def _():
        hpad_ref[pl.ds(0, 1)] = fc1_rows(x_ref[0, pl.ds(h0 - 1, 1)])

    @pl.when(i == n_strips - 1)
    def _():
        hpad_ref[pl.ds(th + 1, 1)] = zero_row

    @pl.when(i < n_strips - 1)
    def _():
        hpad_ref[pl.ds(th + 1, 1)] = fc1_rows(x_ref[0, pl.ds(h0 + th, 1)])

    # Depthwise 3x3 conv + bias + GELU.  H taps: leading-dim slices of the halo
    # scratch (cheap).  W taps: XLU roll; the two W-edge masks are hoisted and
    # applied once per side instead of once per rolled tap.
    wt = wc_ref[...].astype(jnp.float32)        # (9, C_hid)
    bconv = bc_ref[...].astype(jnp.float32)     # (1, C_hid)
    col = lax.broadcasted_iota(jnp.int32, (th, W, C_hid), 1)
    has_left = col >= 1                         # w=0 has no left neighbour
    has_right = col <= W - 2                    # w=W-1 has no right neighbour

    center = jnp.zeros((th, W, C_hid), jnp.float32)
    left = jnp.zeros((th, W, C_hid), jnp.float32)
    right = jnp.zeros((th, W, C_hid), jnp.float32)
    for dh in range(3):                         # static unroll
        xb = hpad_ref[dh:dh + th]               # (th, W, C_hid)
        left = left + pltpu.roll(xb, shift=1, axis=1) * wt[dh * 3 + 0]
        center = center + xb * wt[dh * 3 + 1]
        right = right + pltpu.roll(xb, shift=W - 1, axis=1) * wt[dh * 3 + 2]
    acc = (center
           + jnp.where(has_left, left, 0.0)
           + jnp.where(has_right, right, 0.0))
    a = _gelu_tanh(acc + bconv)                 # (th, W, C_hid) f32

    # fc2 fused into the same kernel: the activated hidden strip never goes to
    # HBM.  (th*W, C_hid) @ w2^T + b2, written as one lane-dense strip.
    out = lax.dot_general(
        a.reshape(th * W, C_hid), w2_ref[...],
        (((1,), (1,)), ((), ())),
        preferred_element_type=jnp.float32) + b2_ref[...]
    o_ref[0] = out.astype(o_ref.dtype)


def _pick_strip_rows(H, target=32):
    """Largest divisor of H that is <= target (whole image for small H)."""
    if H <= target:
        return H
    th = 1
    for cand in range(2, target + 1):
        if H % cand == 0:
            th = cand
    return th


def mlp_pallas(x, H, W, params, *, strip_rows=None):
    """Fused Mlp forward.  x: (B, N=H*W, C_in); params in PyTorch layouts."""
    B, N, C_in = x.shape
    assert N == H * W, "sequence length must equal H*W"
    w1, b1 = params["fc1_w"], params["fc1_b"]   # (C_hid, C_in), (C_hid,)
    wc, bc = params["dw_w"], params["dw_b"]     # (C_hid, 1, 3, 3), (C_hid,)
    w2, b2 = params["fc2_w"], params["fc2_b"]   # (C_out, C_hid), (C_out,)
    C_hid = w1.shape[0]
    C_out = w2.shape[0]

    th = strip_rows if strip_rows is not None else _pick_strip_rows(H)
    assert H % th == 0, "strip_rows must divide H"
    n_strips = H // th

    # (B, N, C) row-major is bit-identical to (B, H, W, C): free reshape,
    # no NCHW round-trip and no HBM padding.
    x_img = x.reshape(B, H, W, C_in)
    # Tiny one-time reshuffle of the 3x3 depthwise taps into (9, C_hid).
    w9 = jnp.transpose(wc[:, 0, :, :], (1, 2, 0)).reshape(9, C_hid)
    b1_2 = b1.reshape(1, C_hid)
    bc_2 = bc.reshape(1, C_hid)
    b2_2 = b2.reshape(1, C_out)

    # VMEM budget (v7x: 64 MiB total, 32 MiB default scoped): double-buffered
    # inputs/outputs + halo scratch + headroom for conv temporaries / spills.
    f32 = 4
    resident = (H * W * C_in + C_hid * C_in + 9 * C_hid + 2 * C_hid
                + C_out * C_hid + C_out) * f32
    per_step = (th * W * C_out + (th + 2) * W * C_hid) * f32
    temporaries = 8 * th * W * C_hid * f32
    est = 2 * resident + 2 * per_step + temporaries
    vmem_limit = int(min(max(2 * est, 32 * 1024 * 1024), 64 * 1024 * 1024))

    return pl.pallas_call(
        _mlp_fused_kernel,
        out_shape=jax.ShapeDtypeStruct((B, N, C_out), x.dtype),
        grid_spec=pltpu.PrefetchScalarGridSpec(
            num_scalar_prefetch=0,
            grid=(B, n_strips),
            in_specs=[
                # Input image: resident across the strip axis (re-DMA'd only when
                # the batch index changes -> each element read from HBM once).
                pl.BlockSpec((1, H, W, C_in), lambda b, i: (b, 0, 0, 0)),
                pl.BlockSpec((C_hid, C_in), lambda b, i: (0, 0)),    # fc1 weight
                pl.BlockSpec((1, C_hid), lambda b, i: (0, 0)),       # fc1 bias
                pl.BlockSpec((9, C_hid), lambda b, i: (0, 0)),       # dw taps
                pl.BlockSpec((1, C_hid), lambda b, i: (0, 0)),       # dw bias
                pl.BlockSpec((C_out, C_hid), lambda b, i: (0, 0)),   # fc2 weight
                pl.BlockSpec((1, C_out), lambda b, i: (0, 0)),       # fc2 bias
            ],
            out_specs=pl.BlockSpec((1, th * W, C_out), lambda b, i: (b, i, 0)),
            scratch_shapes=[pltpu.VMEM((th + 2, W, C_hid), jnp.float32)],
        ),
        compiler_params=pltpu.CompilerParams(
            dimension_semantics=("parallel", "parallel"),
            vmem_limit_bytes=vmem_limit),
    )(x_img, w1, b1_2, w9, bc_2, w2, b2_2)
    # TODO(synk): nn.Dropout(p=0.0) is the identity in forward and is omitted.


# ---------------------------------------------------------------------------
# Plain-JAX reference for validation.
# ---------------------------------------------------------------------------
def mlp_reference(x, H, W, params):
    B, N, _ = x.shape
    h = jnp.matmul(x, params["fc1_w"].T,
                   precision=lax.Precision.HIGHEST) + params["fc1_b"]
    C_hid = h.shape[-1]
    img = h.reshape(B, H, W, C_hid)
    rhs = jnp.transpose(params["dw_w"], (2, 3, 1, 0))   # (3, 3, 1, C_hid) HWIO
    y = lax.conv_general_dilated(
        img, rhs, window_strides=(1, 1), padding=((1, 1), (1, 1)),
        dimension_numbers=("NHWC", "HWIO", "NHWC"),
        feature_group_count=C_hid, precision=lax.Precision.HIGHEST) + params["dw_b"]
    a = _gelu_tanh(y).reshape(B, N, C_hid)
    return jnp.matmul(a, params["fc2_w"].T,
                      precision=lax.Precision.HIGHEST) + params["fc2_b"]


if __name__ == "__main__":
    key = jax.random.PRNGKey(0)
    ks = jax.random.split(key, 7)

    B, H, W = 2, 16, 16
    N = H * W
    C_in, C_hid, C_out = 64, 128, 64

    x = jax.random.normal(ks[0], (B, N, C_in), jnp.float32)
    params = dict(
        fc1_w=jax.random.normal(ks[1], (C_hid, C_in), jnp.float32) * 0.2,
        fc1_b=jax.random.normal(ks[2], (C_hid,), jnp.float32) * 0.1,
        dw_w=jax.random.normal(ks[3], (C_hid, 1, 3, 3), jnp.float32) * 0.3,
        dw_b=jax.random.normal(ks[4], (C_hid,), jnp.float32) * 0.1,
        fc2_w=jax.random.normal(ks[5], (C_out, C_hid), jnp.float32) * 0.2,
        fc2_b=jax.random.normal(ks[6], (C_out,), jnp.float32) * 0.1,
    )

    ref = mlp_reference(x, H, W, params)

    # Single-strip path (th = H): whole image handled in one grid step per batch.
    out = jax.block_until_ready(mlp_pallas(x, H, W, params))
    assert out.shape == (B, N, C_out)
    assert jnp.allclose(out, ref, atol=5e-2, rtol=5e-2), (
        "single-strip mismatch, max abs err = %f"
        % float(jnp.max(jnp.abs(out - ref))))

    # Multi-strip path: exercises the H-halo recompute / zero-pad branches.
    out2 = jax.block_until_ready(mlp_pallas(x, H, W, params, strip_rows=8))
    assert jnp.allclose(out2, ref, atol=5e-2, rtol=5e-2), (
        "multi-strip mismatch, max abs err = %f"
        % float(jnp.max(jnp.abs(out2 - ref))))

    print("KERNEL_OK")
</pallas_src>

<mosaic_0001>
module attributes {stable_mosaic.version = 11 : i64} {
  func.func @_mlp_fused_kernel(%arg0: i32, %arg1: i32, %arg2: memref<1x16x16x64xf32, #tpu.memory_space<vmem>>, %arg3: memref<128x64xf32, #tpu.memory_space<vmem>>, %arg4: memref<1x128xf32, #tpu.memory_space<vmem>>, %arg5: memref<9x128xf32, #tpu.memory_space<vmem>>, %arg6: memref<1x128xf32, #tpu.memory_space<vmem>>, %arg7: memref<64x128xf32, #tpu.memory_space<vmem>>, %arg8: memref<1x64xf32, #tpu.memory_space<vmem>>, %arg9: memref<1x256x64xf32, #tpu.memory_space<vmem>>, %arg10: memref<18x16x128xf32, #tpu.memory_space<vmem>>) attributes {dimension_semantics = [#tpu.dimension_semantics<parallel>, #tpu.dimension_semantics<parallel>], iteration_bounds = array<i64: 2, 1>, scalar_prefetch = 0 : i64, scratch_operands = 1 : i64, tpu.core_type = #tpu.core_type<tc>, window_params = [{transform_indices = @transform_0, window_bounds = array<i64: 1, 16, 16, 64>}, {pipeline_mode = #tpu.pipeline_mode<synchronous>, transform_indices = @transform_1, window_bounds = array<i64: 128, 64>}, {pipeline_mode = #tpu.pipeline_mode<synchronous>, transform_indices = @transform_2, window_bounds = array<i64: 1, 128>}, {pipeline_mode = #tpu.pipeline_mode<synchronous>, transform_indices = @transform_3, window_bounds = array<i64: 9, 128>}, {pipeline_mode = #tpu.pipeline_mode<synchronous>, transform_indices = @transform_4, window_bounds = array<i64: 1, 128>}, {pipeline_mode = #tpu.pipeline_mode<synchronous>, transform_indices = @transform_5, window_bounds = array<i64: 64, 128>}, {pipeline_mode = #tpu.pipeline_mode<synchronous>, transform_indices = @transform_6, window_bounds = array<i64: 1, 64>}, {transform_indices = @transform_7, window_bounds = array<i64: 1, 256, 64>}]} {
    %c16_i32 = arith.constant 16 : i32
    %0 = arith.muli %arg1, %c16_i32 : i32
    %1 = tpu.assume_multiple %0, 16 : i32
    %c0 = arith.constant 0 : index
    %c0_0 = arith.constant 0 : index
    %2 = vector.load %arg3[%c0, %c0_0] : memref<128x64xf32, #tpu.memory_space<vmem>>, vector<128x64xf32>
    %c0_1 = arith.constant 0 : index
    %c0_2 = arith.constant 0 : index
    %3 = vector.load %arg4[%c0_1, %c0_2] : memref<1x128xf32, #tpu.memory_space<vmem>>, vector<1x128xf32>
    %c0_3 = arith.constant 0 : index
    %4 = arith.index_cast %1 : i32 to index
    %c0_4 = arith.constant 0 : index
    %c0_5 = arith.constant 0 : index
    %5 = vector.load %arg2[%c0_3, %4, %c0_4, %c0_5] : memref<1x16x16x64xf32, #tpu.memory_space<vmem>>, vector<1x16x16x64xf32>
    %6 = vector.shape_cast %5 : vector<1x16x16x64xf32> to vector<16x16x64xf32>
    %7 = vector.shape_cast %6 : vector<16x16x64xf32> to vector<256x64xf32>
    %cst = arith.constant dense<0.000000e+00> : vector<256x128xf32>
    %8 = tpu.matmul %7, %2, %cst {dimension_numbers = #tpu.dot_dimension_numbers<[1], [1], [0], [0], [0, 0, 1, 0], [], []>} : vector<256x64xf32>, vector<128x64xf32>, vector<256x128xf32> -> vector<256x128xf32>
    %9 = vector.broadcast %3 : vector<1x128xf32> to vector<256x128xf32>
    %10 = arith.addf %8, %9 : vector<256x128xf32>
    %11 = vector.shape_cast %10 : vector<256x128xf32> to vector<16x16x128xf32>
    %c1 = arith.constant 1 : index
    %c0_6 = arith.constant 0 : index
    %c0_7 = arith.constant 0 : index
    %12 = vector.load %arg10[%c1, %c0_6, %c0_7] : memref<18x16x128xf32, #tpu.memory_space<vmem>>, vector<16x16x128xf32>
    tpu.vector_store %arg10[%c1, %c0_6, %c0_7], %11 {strides = array<i32>} : memref<18x16x128xf32, #tpu.memory_space<vmem>>, vector<16x16x128xf32>,
    %cst_8 = arith.constant 0.000000e+00 : f32
    %13 = vector.broadcast %cst_8 : f32 to vector<1x16x128xf32>
    %c0_i32 = arith.constant 0 : i32
    %14 = arith.cmpi eq, %arg1, %c0_i32 : i32
    %15 = arith.extui %14 : i1 to i32
    %c0_i32_9 = arith.constant 0 : i32
    %16 = arith.cmpi ne, %15, %c0_i32_9 : i32
    scf.if %16 {
      %c0_50 = arith.constant 0 : index
      %c0_51 = arith.constant 0 : index
      %c0_52 = arith.constant 0 : index
      %130 = vector.load %arg10[%c0_50, %c0_51, %c0_52] : memref<18x16x128xf32, #tpu.memory_space<vmem>>, vector<1x16x128xf32>
      tpu.vector_store %arg10[%c0_50, %c0_51, %c0_52], %13 {strides = array<i32>} : memref<18x16x128xf32, #tpu.memory_space<vmem>>, vector<1x16x128xf32>,
    } else {
    }
    %c0_i32_10 = arith.constant 0 : i32
    %17 = arith.cmpi sgt, %arg1, %c0_i32_10 : i32
    %18 = arith.extui %17 : i1 to i32
    %c0_i32_11 = arith.constant 0 : i32
    %19 = arith.cmpi ne, %18, %c0_i32_11 : i32
    scf.if %19 {
      %c1_i32_50 = arith.constant 1 : i32
      %130 = arith.subi %1, %c1_i32_50 : i32
      %c0_51 = arith.constant 0 : index
      %131 = arith.index_cast %130 : i32 to index
      %c0_52 = arith.constant 0 : index
      %c0_53 = arith.constant 0 : index
      %132 = vector.load %arg2[%c0_51, %131, %c0_52, %c0_53] : memref<1x16x16x64xf32, #tpu.memory_space<vmem>>, vector<1x1x16x64xf32>
      %133 = vector.shape_cast %132 : vector<1x1x16x64xf32> to vector<1x16x64xf32>
      %134 = vector.shape_cast %133 : vector<1x16x64xf32> to vector<16x64xf32>
      %cst_54 = arith.constant dense<0.000000e+00> : vector<16x128xf32>
      %135 = tpu.matmul %134, %2, %cst_54 {dimension_numbers = #tpu.dot_dimension_numbers<[1], [1], [0], [0], [0, 0, 1, 0], [], []>} : vector<16x64xf32>, vector<128x64xf32>, vector<16x128xf32> -> vector<16x128xf32>
      %136 = vector.broadcast %3 : vector<1x128xf32> to vector<16x128xf32>
      %137 = arith.addf %135, %136 : vector<16x128xf32>
      %138 = vector.shape_cast %137 : vector<16x128xf32> to vector<1x16x128xf32>
      %c0_55 = arith.constant 0 : index
      %c0_56 = arith.constant 0 : index
      %c0_57 = arith.constant 0 : index
      %139 = vector.load %arg10[%c0_55, %c0_56, %c0_57] : memref<18x16x128xf32, #tpu.memory_space<vmem>>, vector<1x16x128xf32>
      tpu.vector_store %arg10[%c0_55, %c0_56, %c0_57], %138 {strides = array<i32>} : memref<18x16x128xf32, #tpu.memory_space<vmem>>, vector<1x16x128xf32>,
    } else {
    }
    %c0_i32_12 = arith.constant 0 : i32
    %20 = arith.cmpi eq, %arg1, %c0_i32_12 : i32
    %21 = arith.extui %20 : i1 to i32
    %c0_i32_13 = arith.constant 0 : i32
    %22 = arith.cmpi ne, %21, %c0_i32_13 : i32
    scf.if %22 {
      %c17 = arith.constant 17 : index
      %c0_50 = arith.constant 0 : index
      %c0_51 = arith.constant 0 : index
      %130 = vector.load %arg10[%c17, %c0_50, %c0_51] : memref<18x16x128xf32, #tpu.memory_space<vmem>>, vector<1x16x128xf32>
      tpu.vector_store %arg10[%c17, %c0_50, %c0_51], %13 {strides = array<i32>} : memref<18x16x128xf32, #tpu.memory_space<vmem>>, vector<1x16x128xf32>,
    } else {
    }
    %c0_i32_14 = arith.constant 0 : i32
    %23 = arith.cmpi slt, %arg1, %c0_i32_14 : i32
    %24 = arith.extui %23 : i1 to i32
    %c0_i32_15 = arith.constant 0 : i32
    %25 = arith.cmpi ne, %24, %c0_i32_15 : i32
    scf.if %25 {
      %c16_i32_50 = arith.constant 16 : i32
      %130 = arith.addi %1, %c16_i32_50 : i32
      %c0_51 = arith.constant 0 : index
      %131 = arith.index_cast %130 : i32 to index
      %c0_52 = arith.constant 0 : index
      %c0_53 = arith.constant 0 : index
      %132 = vector.load %arg2[%c0_51, %131, %c0_52, %c0_53] : memref<1x16x16x64xf32, #tpu.memory_space<vmem>>, vector<1x1x16x64xf32>
      %133 = vector.shape_cast %132 : vector<1x1x16x64xf32> to vector<1x16x64xf32>
      %134 = vector.shape_cast %133 : vector<1x16x64xf32> to vector<16x64xf32>
      %cst_54 = arith.constant dense<0.000000e+00> : vector<16x128xf32>
      %135 = tpu.matmul %134, %2, %cst_54 {dimension_numbers = #tpu.dot_dimension_numbers<[1], [1], [0], [0], [0, 0, 1, 0], [], []>} : vector<16x64xf32>, vector<128x64xf32>, vector<16x128xf32> -> vector<16x128xf32>
      %136 = vector.broadcast %3 : vector<1x128xf32> to vector<16x128xf32>
      %137 = arith.addf %135, %136 : vector<16x128xf32>
      %138 = vector.shape_cast %137 : vector<16x128xf32> to vector<1x16x128xf32>
      %c17 = arith.constant 17 : index
      %c0_55 = arith.constant 0 : index
      %c0_56 = arith.constant 0 : index
      %139 = vector.load %arg10[%c17, %c0_55, %c0_56] : memref<18x16x128xf32, #tpu.memory_space<vmem>>, vector<1x16x128xf32>
      tpu.vector_store %arg10[%c17, %c0_55, %c0_56], %138 {strides = array<i32>} : memref<18x16x128xf32, #tpu.memory_space<vmem>>, vector<1x16x128xf32>,
    } else {
    }
    %c0_16 = arith.constant 0 : index
    %c0_17 = arith.constant 0 : index
    %26 = vector.load %arg5[%c0_16, %c0_17] : memref<9x128xf32, #tpu.memory_space<vmem>>, vector<9x128xf32>
    %c0_18 = arith.constant 0 : index
    %c0_19 = arith.constant 0 : index
    %27 = vector.load %arg6[%c0_18, %c0_19] : memref<1x128xf32, #tpu.memory_space<vmem>>, vector<1x128xf32>
    %28 = tpu.iota {dimensions = array<i32: 1>} : vector<16x16x128xi32>
    %c1_i32 = arith.constant 1 : i32
    %29 = vector.broadcast %c1_i32 : i32 to vector<16x16x128xi32>
    %30 = arith.cmpi sge, %28, %29 : vector<16x16x128xi32>
    %c14_i32 = arith.constant 14 : i32
    %31 = vector.broadcast %c14_i32 : i32 to vector<16x16x128xi32>
    %32 = arith.cmpi sle, %28, %31 : vector<16x16x128xi32>
    %cst_20 = arith.constant 0.000000e+00 : f32
    %33 = vector.broadcast %cst_20 : f32 to vector<16x16x128xf32>
    %cst_21 = arith.constant 0.000000e+00 : f32
    %34 = vector.broadcast %cst_21 : f32 to vector<16x16x128xf32>
    %cst_22 = arith.constant 0.000000e+00 : f32
    %35 = vector.broadcast %cst_22 : f32 to vector<16x16x128xf32>
    %c0_23 = arith.constant 0 : index
    %c0_24 = arith.constant 0 : index
    %c0_25 = arith.constant 0 : index
    %36 = vector.load %arg10[%c0_23, %c0_24, %c0_25] : memref<18x16x128xf32, #tpu.memory_space<vmem>>, vector<16x16x128xf32>
    %c1_i32_26 = arith.constant 1 : i32
    %37 = tpu.dynamic_rotate %36 by %c1_i32_26 dim 1 : vector<16x16x128xf32>, i32 -> vector<16x16x128xf32>
    %38 = vector.extract_strided_slice %26 {offsets = [0, 0], sizes = [1, 128], strides = [1, 1]} : vector<9x128xf32> to vector<1x128xf32>
    %39 = vector.shape_cast %38 : vector<1x128xf32> to vector<128xf32>
    %40 = vector.shape_cast %39 : vector<128xf32> to vector<1x1x128xf32>
    %41 = vector.broadcast %40 : vector<1x1x128xf32> to vector<16x16x128xf32>
    %42 = arith.mulf %37, %41 : vector<16x16x128xf32>
    %43 = arith.addf %34, %42 : vector<16x16x128xf32>
    %44 = vector.extract_strided_slice %26 {offsets = [1, 0], sizes = [1, 128], strides = [1, 1]} : vector<9x128xf32> to vector<1x128xf32>
    %45 = vector.shape_cast %44 : vector<1x128xf32> to vector<128xf32>
    %46 = vector.shape_cast %45 : vector<128xf32> to vector<1x1x128xf32>
    %47 = vector.broadcast %46 : vector<1x1x128xf32> to vector<16x16x128xf32>
    %48 = arith.mulf %36, %47 : vector<16x16x128xf32>
    %49 = arith.addf %33, %48 : vector<16x16x128xf32>
    %c15_i32 = arith.constant 15 : i32
    %50 = tpu.dynamic_rotate %36 by %c15_i32 dim 1 : vector<16x16x128xf32>, i32 -> vector<16x16x128xf32>
    %51 = vector.extract_strided_slice %26 {offsets = [2, 0], sizes = [1, 128], strides = [1, 1]} : vector<9x128xf32> to vector<1x128xf32>
    %52 = vector.shape_cast %51 : vector<1x128xf32> to vector<128xf32>
    %53 = vector.shape_cast %52 : vector<128xf32> to vector<1x1x128xf32>
    %54 = vector.broadcast %53 : vector<1x1x128xf32> to vector<16x16x128xf32>
    %55 = arith.mulf %50, %54 : vector<16x16x128xf32>
    %56 = arith.addf %35, %55 : vector<16x16x128xf32>
    %c1_27 = arith.constant 1 : index
    %c0_28 = arith.constant 0 : index
    %c0_29 = arith.constant 0 : index
    %57 = vector.load %arg10[%c1_27, %c0_28, %c0_29] : memref<18x16x128xf32, #tpu.memory_space<vmem>>, vector<16x16x128xf32>
    %c1_i32_30 = arith.constant 1 : i32
    %58 = tpu.dynamic_rotate %57 by %c1_i32_30 dim 1 : vector<16x16x128xf32>, i32 -> vector<16x16x128xf32>
    %59 = vector.extract_strided_slice %26 {offsets = [3, 0], sizes = [1, 128], strides = [1, 1]} : vector<9x128xf32> to vector<1x128xf32>
    %60 = vector.shape_cast %59 : vector<1x128xf32> to vector<128xf32>
    %61 = vector.shape_cast %60 : vector<128xf32> to vector<1x1x128xf32>
    %62 = vector.broadcast %61 : vector<1x1x128xf32> to vector<16x16x128xf32>
    %63 = arith.mulf %58, %62 : vector<16x16x128xf32>
    %64 = arith.addf %43, %63 : vector<16x16x128xf32>
    %65 = vector.extract_strided_slice %26 {offsets = [4, 0], sizes = [1, 128], strides = [1, 1]} : vector<9x128xf32> to vector<1x128xf32>
    %66 = vector.shape_cast %65 : vector<1x128xf32> to vector<128xf32>
    %67 = vector.shape_cast %66 : vector<128xf32> to vector<1x1x128xf32>
    %68 = vector.broadcast %67 : vector<1x1x128xf32> to vector<16x16x128xf32>
    %69 = arith.mulf %57, %68 : vector<16x16x128xf32>
    %70 = arith.addf %49, %69 : vector<16x16x128xf32>
    %c15_i32_31 = arith.constant 15 : i32
    %71 = tpu.dynamic_rotate %57 by %c15_i32_31 dim 1 : vector<16x16x128xf32>, i32 -> vector<16x16x128xf32>
    %72 = vector.extract_strided_slice %26 {offsets = [5, 0], sizes = [1, 128], strides = [1, 1]} : vector<9x128xf32> to vector<1x128xf32>
    %73 = vector.shape_cast %72 : vector<1x128xf32> to vector<128xf32>
    %74 = vector.shape_cast %73 : vector<128xf32> to vector<1x1x128xf32>
    %75 = vector.broadcast %74 : vector<1x1x128xf32> to vector<16x16x128xf32>
    %76 = arith.mulf %71, %75 : vector<16x16x128xf32>
    %77 = arith.addf %56, %76 : vector<16x16x128xf32>
    %c2 = arith.constant 2 : index
    %c0_32 = arith.constant 0 : index
    %c0_33 = arith.constant 0 : index
    %78 = vector.load %arg10[%c2, %c0_32, %c0_33] : memref<18x16x128xf32, #tpu.memory_space<vmem>>, vector<16x16x128xf32>
    %c1_i32_34 = arith.constant 1 : i32
    %79 = tpu.dynamic_rotate %78 by %c1_i32_34 dim 1 : vector<16x16x128xf32>, i32 -> vector<16x16x128xf32>
    %80 = vector.extract_strided_slice %26 {offsets = [6, 0], sizes = [1, 128], strides = [1, 1]} : vector<9x128xf32> to vector<1x128xf32>
    %81 = vector.shape_cast %80 : vector<1x128xf32> to vector<128xf32>
    %82 = vector.shape_cast %81 : vector<128xf32> to vector<1x1x128xf32>
    %83 = vector.broadcast %82 : vector<1x1x128xf32> to vector<16x16x128xf32>
    %84 = arith.mulf %79, %83 : vector<16x16x128xf32>
    %85 = arith.addf %64, %84 : vector<16x16x128xf32>
    %86 = vector.extract_strided_slice %26 {offsets = [7, 0], sizes = [1, 128], strides = [1, 1]} : vector<9x128xf32> to vector<1x128xf32>
    %87 = vector.shape_cast %86 : vector<1x128xf32> to vector<128xf32>
    %88 = vector.shape_cast %87 : vector<128xf32> to vector<1x1x128xf32>
    %89 = vector.broadcast %88 : vector<1x1x128xf32> to vector<16x16x128xf32>
    %90 = arith.mulf %78, %89 : vector<16x16x128xf32>
    %91 = arith.addf %70, %90 : vector<16x16x128xf32>
    %c15_i32_35 = arith.constant 15 : i32
    %92 = tpu.dynamic_rotate %78 by %c15_i32_35 dim 1 : vector<16x16x128xf32>, i32 -> vector<16x16x128xf32>
    %93 = vector.extract_strided_slice %26 {offsets = [8, 0], sizes = [1, 128], strides = [1, 1]} : vector<9x128xf32> to vector<1x128xf32>
    %94 = vector.shape_cast %93 : vector<1x128xf32> to vector<128xf32>
    %95 = vector.shape_cast %94 : vector<128xf32> to vector<1x1x128xf32>
    %96 = vector.broadcast %95 : vector<1x1x128xf32> to vector<16x16x128xf32>
    %97 = arith.mulf %92, %96 : vector<16x16x128xf32>
    %98 = arith.addf %77, %97 : vector<16x16x128xf32>
    %cst_36 = arith.constant 0.000000e+00 : f32
    %99 = vector.broadcast %cst_36 : f32 to vector<16x16x128xf32>
    %100 = arith.select %30, %85, %99 : vector<16x16x128xi1>, vector<16x16x128xf32>
    %101 = arith.addf %91, %100 : vector<16x16x128xf32>
    %cst_37 = arith.constant 0.000000e+00 : f32
    %102 = vector.broadcast %cst_37 : f32 to vector<16x16x128xf32>
    %103 = arith.select %32, %98, %102 : vector<16x16x128xi1>, vector<16x16x128xf32>
    %104 = arith.addf %101, %103 : vector<16x16x128xf32>
    %105 = vector.shape_cast %27 : vector<1x128xf32> to vector<1x1x128xf32>
    %106 = vector.broadcast %105 : vector<1x1x128xf32> to vector<16x16x128xf32>
    %107 = arith.addf %104, %106 : vector<16x16x128xf32>
    %cst_38 = arith.constant 5.000000e-01 : f32
    %108 = vector.broadcast %cst_38 : f32 to vector<16x16x128xf32>
    %109 = arith.mulf %108, %107 : vector<16x16x128xf32>
    %cst_39 = arith.constant 4.471500e-02 : f32
    %110 = vector.broadcast %cst_39 : f32 to vector<16x16x128xf32>
    %111 = arith.mulf %110, %107 : vector<16x16x128xf32>
    %112 = arith.mulf %111, %107 : vector<16x16x128xf32>
    %113 = arith.mulf %112, %107 : vector<16x16x128xf32>
    %114 = arith.addf %107, %113 : vector<16x16x128xf32>
    %cst_40 = arith.constant 0.797884583 : f32
    %115 = vector.broadcast %cst_40 : f32 to vector<16x16x128xf32>
    %116 = arith.mulf %115, %114 : vector<16x16x128xf32>
    %117 = math.tanh %116 : vector<16x16x128xf32>
    %cst_41 = arith.constant 1.000000e+00 : f32
    %118 = vector.broadcast %cst_41 : f32 to vector<16x16x128xf32>
    %119 = arith.addf %118, %117 : vector<16x16x128xf32>
    %120 = arith.mulf %109, %119 : vector<16x16x128xf32>
    %121 = vector.shape_cast %120 : vector<16x16x128xf32> to vector<256x128xf32>
    %c0_42 = arith.constant 0 : index
    %c0_43 = arith.constant 0 : index
    %122 = vector.load %arg7[%c0_42, %c0_43] : memref<64x128xf32, #tpu.memory_space<vmem>>, vector<64x128xf32>
    %cst_44 = arith.constant dense<0.000000e+00> : vector<256x64xf32>
    %123 = tpu.matmul %121, %122, %cst_44 {dimension_numbers = #tpu.dot_dimension_numbers<[1], [1], [0], [0], [0, 0, 1, 0], [], []>} : vector<256x128xf32>, vector<64x128xf32>, vector<256x64xf32> -> vector<256x64xf32>
    %c0_45 = arith.constant 0 : index
    %c0_46 = arith.constant 0 : index
    %124 = vector.load %arg8[%c0_45, %c0_46] : memref<1x64xf32, #tpu.memory_space<vmem>>, vector<1x64xf32>
    %125 = vector.broadcast %124 : vector<1x64xf32> to vector<256x64xf32>
    %126 = arith.addf %123, %125 : vector<256x64xf32>
    %c0_47 = arith.constant 0 : index
    %c0_48 = arith.constant 0 : index
    %c0_49 = arith.constant 0 : index
    %127 = vector.load %arg9[%c0_47, %c0_48, %c0_49] : memref<1x256x64xf32, #tpu.memory_space<vmem>>, vector<1x256x64xf32>
    %128 = vector.shape_cast %127 : vector<1x256x64xf32> to vector<256x64xf32>
    %129 = vector.shape_cast %126 : vector<256x64xf32> to vector<1x256x64xf32>
    tpu.vector_store %arg9[%c0_47, %c0_48, %c0_49], %129 {strides = array<i32>} : memref<1x256x64xf32, #tpu.memory_space<vmem>>, vector<1x256x64xf32>,
    return
  }
  func.func @transform_0(%arg0: i32, %arg1: i32) -> (i32, i32, i32, i32) {
    %c0_i32 = arith.constant 0 : i32
    %c0_i32_0 = arith.constant 0 : i32
    %c0_i32_1 = arith.constant 0 : i32
    %c0_i32_2 = arith.constant 0 : i32
    return %arg0, %c0_i32, %c0_i32_0, %c0_i32_1 : i32, i32, i32, i32
  }
  func.func @transform_1(%arg0: i32, %arg1: i32) -> (i32, i32) {
    %c0_i32 = arith.constant 0 : i32
    %c0_i32_0 = arith.constant 0 : i32
    %c0_i32_1 = arith.constant 0 : i32
    return %c0_i32, %c0_i32_0 : i32, i32
  }
  func.func @transform_2(%arg0: i32, %arg1: i32) -> (i32, i32) {
    %c0_i32 = arith.constant 0 : i32
    %c0_i32_0 = arith.constant 0 : i32
    %c0_i32_1 = arith.constant 0 : i32
    return %c0_i32, %c0_i32_0 : i32, i32
  }
  func.func @transform_3(%arg0: i32, %arg1: i32) -> (i32, i32) {
    %c0_i32 = arith.constant 0 : i32
    %c0_i32_0 = arith.constant 0 : i32
    %c0_i32_1 = arith.constant 0 : i32
    return %c0_i32, %c0_i32_0 : i32, i32
  }
  func.func @transform_4(%arg0: i32, %arg1: i32) -> (i32, i32) {
    %c0_i32 = arith.constant 0 : i32
    %c0_i32_0 = arith.constant 0 : i32
    %c0_i32_1 = arith.constant 0 : i32
    return %c0_i32, %c0_i32_0 : i32, i32
  }
  func.func @transform_5(%arg0: i32, %arg1: i32) -> (i32, i32) {
    %c0_i32 = arith.constant 0 : i32
    %c0_i32_0 = arith.constant 0 : i32
    %c0_i32_1 = arith.constant 0 : i32
    return %c0_i32, %c0_i32_0 : i32, i32
  }
  func.func @transform_6(%arg0: i32, %arg1: i32) -> (i32, i32) {
    %c0_i32 = arith.constant 0 : i32
    %c0_i32_0 = arith.constant 0 : i32
    %c0_i32_1 = arith.constant 0 : i32
    return %c0_i32, %c0_i32_0 : i32, i32
  }
  func.func @transform_7(%arg0: i32, %arg1: i32) -> (i32, i32, i32) {
    %c0_i32 = arith.constant 0 : i32
    %c0_i32_0 = arith.constant 0 : i32
    return %arg0, %arg1, %c0_i32 : i32, i32, i32
  }
}

</mosaic_0001>

<bundles_post_ra>
// kernel: tpu_custom_call.1
= control target key start
LH: loop header
LB: loop body
LE: loop exit
PB: predicated region body
PF: predicated region fallthrough
CT: control target
= control target key end

     0   :  { %12 = vsyncpa [#allocation4], 0  ;;  %s5053_s0 = inlined_call_operand.hbm [shape: f32[2,16,16,64], index: 0, kind: input, shape index: {}]   ;;  %s5054_s1 = inlined_call_operand.vmem [shape: f32[128,64], index: 1, kind: input, shape index: {}]   ;;  %s5055_s2 = inlined_call_operand.vmem [shape: f32[1,128], index: 2, kind: input, shape index: {}]   ;;  %s5056_s3 = inlined_call_operand.vmem [shape: f32[9,128], index: 3, kind: input, shape index: {}]   ;;  %s5057_s4 = inlined_call_operand.vmem [shape: f32[1,128], index: 4, kind: input, shape index: {}]   ;;  %s5058_s5 = inlined_call_operand.vmem [shape: f32[64,128], index: 5, kind: input, shape index: {}]   ;;  %s5059_s6 = inlined_call_operand.vmem [shape: f32[1,64], index: 6, kind: input, shape index: {}]   ;;  %s5060_s7 = inlined_call_operand.vmem [shape: f32[2,256,64], index: 7, kind: output, shape index: {}]  }
   0x1   :  { %14 = vsyncpa [#allocation4 + $0x1], 0  ;;  %s3499_s24 = smov 0   ;;  %s3501_s25 = smov 0  }
   0x2   :  { %s3503_s26 = smov 0   ;;  %s3505_s27 = smov 0  }
   0x3   :  { %s3507_s28 = smov 0   ;;  %s3509_s29 = smov 0  }
   0x4 LB: > { %s2911_s30 = sadd.s32 4294967295, %s3453_s29   ;;  %s32_s8 = sadd.s32 1, %s3449_s28  ;;  %s3453_s29 = sphi %s3509_s29, %s20_s29   ;;  %s3449_s28 = sphi %s3507_s28, %s5160_s28   ;;  %s3445_s27 = sphi %s3505_s27, %s5159_s27   ;;  %s3441_s26 = sphi %s3503_s26, %s5158_s26   ;;  %s3437_s25 = sphi %s3501_s25, %s5157_s25   ;;  %s3433_s24 = sphi %s3499_s24, %s5156_s24  }
   0x5   : > { %p34_p0 = scmp.ge.s32.totalorder %s32_s8, 2  ;;  %s39_s9 = sadd.s32 1, %s3441_s26 }
   0x6   : > { %p46_p1 = scmp.ne.s32.totalorder %s3441_s26, %s3437_s25  ;;  %p47_p2 = scmp.eq.s32.totalorder %s3453_s29, 0 }
   0x7   : > { %s5162_s8 = smov (%p34_p0, %s32_s8), 0  ;;  %p52_p4 = scmp.ne.s32.totalorder %s3437_s25, %s3433_s24 }
   0x8   : > { %p3535_p3 = por %p47_p2, %p46_p1  ;;  %s36_s11 = ssub.s32 %s3449_s28, %s5162_s8 }
   0x9   : > { %p53_p5 = scmp.eq.s32.totalorder %s2911_s30, 0  ;;  %p37_p6 = scmp.eq.s32.totalorder %s36_s11, 0 }
   0xa   : > { %p3256_p8 = scmp.lt.s32.totalorder %s3453_s29, 2  ;;  %s248_s14 = sand.u32 1, %s3441_s26  }
   0xb   : > { %p3542_p7 = por %p53_p5, %p52_p4  ;;  %s3016_s15 = sshll.u32 %s3449_s28, 12 }
   0xc   : > { %s3548_s13 = scalar_select %p37_p6, %s3441_s26, %s39_s9  }
   0xd   : > { %s2915_s16 = sshll.u32 %s248_s14, 8  ;;  %s258_s19 = scalar_lea.hbm %s5053_s0, %s3016_s15 }
   0xe   : > { %s252_s20 = scalar_lea.vmem [#allocation3], %s2915_s16  ;;  %p3557_p9 = pnand %p3256_p8, %p3535_p3 }
   0xf   : > { %s259_s21 = sshll.u32 %s252_s20, 4  ;;  %s249_s23 = scalar_lea.sflag [#allocation4], %s248_s14  ;;  %s260_s21 = int_to_ptr.vmem [resolvable:$true] %s259_s21 }
  0x10   : > { %p3377_p10 = pneg %p3557_p9  ;;  %s3388_s24 = scalar_lea.vmem %s260_s21, 4096 }
  0x11   : > { %p3389_p11 = scmp.ne.s32.totalorder %s260_s21, %s3388_s24  ;;  %s3455_s30 = smov [#allocation3]  }
  0x12   : > { %s3393_s9 = sshll.u32 %s3455_s30, 4  ;;  %s3394_s9 = int_to_ptr.vmem [resolvable:$false] %s3393_s9 }
  0x13   : > { %p3391_p12 = pnand %p3389_p11, %p3377_p10  ;;  %s3395_s11 = scalar_lea.vmem %s3394_s9, 8192 }
  0x14   : > { %p3396_p0 = scmp.lt.s32.totalorder %s260_s21, %s3394_s9  ;;  %p3397_p1 = scmp.lt.s32.totalorder %s3395_s11, %s3388_s24 }
  0x15   : > { %p3392_p13 = pneg %p3391_p12 }
  0x16   : > { %p3398_p2 = por %p3397_p1, %p3396_p0 }
  0x18   : > { %p3399_p3 = pnand %p3398_p2, %p3392_p13 }
  0x1a   : > { %3402 = shalt.err (!%p3399_p3)
}
  0x1b   : > { %s3456_s10 = smov 128   ;;  %s3457_s14 = smov 8  }
  0x1c   : > { %3255 = dma.hbm_to_vmem [thread:$0]  (!%p3557_p9), %s258_s19, 4096, %s260_s21, %s249_s23, %s3456_s10, %s3456_s10, %s3457_s14  }
  0x1d   : > { %p2918_p4 = scmp.ge.s32.totalorder %s3453_s29, 1  ;;  %p267_p5 = scmp.lt.s32.totalorder %s3453_s29, 3 }
  0x1f   : > { %p268_p6 = pnand %p2918_p4, %p267_p5 }
  0x21   : > { %271 = sbr.rel (%p268_p6) target bundleno = 782 (0x30e), region = 48 }
  0x26   : > { %s273_s15 = sand.u32 1, %s3437_s25  }
  0x27   : > { %s2919_s16 = sshll.u32 %s273_s15, 8  ;;  %s274_s17 = scalar_lea.sflag [#allocation4], %s273_s15 }
  0x28   : > { %s3568_s18 = scalar_lea.vmem [#allocation3], %s2919_s16 }
  0x29   : > { %3428 = dma.done.wait (%p3542_p7), %s274_s17, 4096  }
  0x2a   : > { %3430 = vsyncadd (%p3542_p7), %s274_s17, 4294963200  ;;  %vm380_vm0 = vcmask 523264   ;;  %v338_v0 = vld [vmem:[%s5054_s1 + $0x78] sm:$0xff]  ;;  %v337_v1 = vld [vmem:[%s5054_s1 + $0x70] sm:$0xff]  ;;  %v983_v55 = vlaneseq  ;;  %p313_p7 = scmp.lt.s32.totalorder %s3445_s27, 1 }
  0x2b   : > { %3106 = vmatprep.subr.msk.mxu0 %vm380_vm0, %v338_v0  ;;  %v336_v2 = vld [vmem:[%s5054_s1 + $0x68] sm:$0xff]  ;;  %v342_v3 = vld [vmem:[%s3568_s18] sm:$0xff]  ;;  %v334_v5 = vld [vmem:[%s5054_s1 + $0x58] sm:$0xff] }
  0x2c   : > { %3107 = vmatpush3.xpose.msk.msra.mxu0 %vm380_vm0, %v338_v0  ;;  %3138 = vmatprep.mubr.msk.f32.mxu0 %vm380_vm0, %v342_v3  ;;  %v335_v4 = vld [vmem:[%s5054_s1 + $0x60] sm:$0xff]  ;;  %v333_v6 = vld [vmem:[%s5054_s1 + $0x50] sm:$0xff]  ;;  %v332_v7 = vld [vmem:[%s5054_s1 + $0x48] sm:$0xff]  ;;  %v3739_v56 = vshrl.u32 %v983_v55, 7  ;;  %s5164_s27 = smov (!%p313_p7, %s3445_s27), 1 }
  0x2d   : > { %3108 = vmatprep.subr.msk.mxu0 %vm380_vm0, %v337_v1  ;;  %v331_v8 = vld [vmem:[%s5054_s1 + $0x40] sm:$0xff]  ;;  %v330_v9 = vld [vmem:[%s5054_s1 + $0x38] sm:$0xff]  ;;  %v329_v10 = vld [vmem:[%s5054_s1 + $0x30] sm:$0xff]  ;;  %s3017_s20 = sshll.u32 %s5164_s27, 8 }
  0x2e   : > { %v328_v11 = vld [vmem:[%s5054_s1 + $0x28] sm:$0xff]  ;;  %v327_v12 = vld [vmem:[%s5054_s1 + $0x20] sm:$0xff]  ;;  %v326_v13 = vld [vmem:[%s5054_s1 + $0x18] sm:$0xff]  ;;  %v1157_v57 = vsub.s32 1, %v3739_v56  ;;  %v1522_v58 = vsub.s32 4, %v3739_v56  ;;  %v1089_v60 = vsub.s32 0, %v3739_v56  ;;  %s4937_s24 = scalar_lea.vmem %s5060_s7, %s3017_s20 }
  0x2f   : > { %v325_v14 = vld [vmem:[%s5054_s1 + $0x10] sm:$0xff]  ;;  %v324_v15 = vld [vmem:[%s5054_s1 + $0x8] sm:$0xff]  ;;  %v323_v16 = vld [vmem:[%s5054_s1] sm:$0xff]  ;;  %v1290_v63 = vsub.s32 2, %v3739_v56  ;;  %v1454_v3 = vsub.s32 3, %v3739_v56  ;;  %vm1054_vm1 = vcmp.lt.s32.totalorder %v3739_v56, 1 }
  0x30   : > { %3109 = vmatpush3.xpose.msk.msra.mxu0 %vm380_vm0, %v337_v1  ;;  %v343_v17 = vld [vmem:[%s3568_s18 + $0x8] sm:$0xff]  ;;  %v344_v18 = vld [vmem:[%s3568_s18 + $0x10] sm:$0xff]  ;;  %v345_v19 = vld [vmem:[%s3568_s18 + $0x18] sm:$0xff]  ;;  %vm1255_vm2 = vcmp.lt.s32.totalorder %v3739_v56, 7  ;;  %vm986_vm3 = vcmp.ge.s32.totalorder %v3739_v56, 1 }
  0x31   : > { %3110 = vmatprep.subr.msk.mxu0 %vm380_vm0, %v336_v2  ;;  %v346_v20 = vld [vmem:[%s3568_s18 + $0x20] sm:$0xff]  ;;  %v347_v21 = vld [vmem:[%s3568_s18 + $0x28] sm:$0xff]  ;;  %v348_v22 = vld [vmem:[%s3568_s18 + $0x30] sm:$0xff] }
  0x32   : > { %v349_v23 = vld [vmem:[%s3568_s18 + $0x38] sm:$0xff]  ;;  %v350_v24 = vld [vmem:[%s3568_s18 + $0x40] sm:$0xff]  ;;  %v351_v25 = vld [vmem:[%s3568_s18 + $0x48] sm:$0xff] }
  0x33   : > { %v352_v26 = vld [vmem:[%s3568_s18 + $0x50] sm:$0xff]  ;;  %v353_v27 = vld [vmem:[%s3568_s18 + $0x58] sm:$0xff]  ;;  %v354_v28 = vld [vmem:[%s3568_s18 + $0x60] sm:$0xff] }
  0x34   : > { %3111 = vmatpush3.xpose.msk.msra.mxu0 %vm380_vm0, %v336_v2  ;;  %v355_v29 = vld [vmem:[%s3568_s18 + $0x68] sm:$0xff]  ;;  %v356_v30 = vld [vmem:[%s3568_s18 + $0x70] sm:$0xff]  ;;  %v357_v31 = vld [vmem:[%s3568_s18 + $0x78] sm:$0xff] }
  0x35   : > { %3112 = vmatprep.subr.msk.mxu0 %vm380_vm0, %v335_v4  ;;  %v358_v32 = vld [vmem:[%s3568_s18 + $0x80] sm:$0xff]  ;;  %v359_v33 = vld [vmem:[%s3568_s18 + $0x88] sm:$0xff]  ;;  %v360_v34 = vld [vmem:[%s3568_s18 + $0x90] sm:$0xff] }
  0x36   : > { %v361_v35 = vld [vmem:[%s3568_s18 + $0x98] sm:$0xff]  ;;  %v362_v36 = vld [vmem:[%s3568_s18 + $0xa0] sm:$0xff]  ;;  %v363_v37 = vld [vmem:[%s3568_s18 + $0xa8] sm:$0xff] }
  0x37   : > { %v364_v38 = vld [vmem:[%s3568_s18 + $0xb0] sm:$0xff]  ;;  %v365_v39 = vld [vmem:[%s3568_s18 + $0xb8] sm:$0xff]  ;;  %v366_v40 = vld [vmem:[%s3568_s18 + $0xc0] sm:$0xff] }
  0x38   : > { %3113 = vmatpush3.xpose.msk.msra.mxu0 %vm380_vm0, %v335_v4  ;;  %v367_v41 = vld [vmem:[%s3568_s18 + $0xc8] sm:$0xff]  ;;  %v368_v42 = vld [vmem:[%s3568_s18 + $0xd0] sm:$0xff]  ;;  %v369_v43 = vld [vmem:[%s3568_s18 + $0xd8] sm:$0xff] }
  0x39   : > { %3114 = vmatprep.subr.msk.mxu0 %vm380_vm0, %v334_v5  ;;  %v370_v44 = vld [vmem:[%s3568_s18 + $0xe0] sm:$0xff]  ;;  %v371_v45 = vld [vmem:[%s3568_s18 + $0xe8] sm:$0xff]  ;;  %v372_v46 = vld [vmem:[%s3568_s18 + $0xf0] sm:$0xff] }
  0x3a   : > { %v373_v47 = vld [vmem:[%s3568_s18 + $0xf8] sm:$0xff]  ;;  %v2545_v49 = vld [vmem:[%s5058_s5 + $0x30] sm:$0xff]  ;;  %v2544_v50 = vld [vmem:[%s5058_s5 + $0x28] sm:$0xff] }
  0x3b   : > { %v2546_v48 = vld [vmem:[%s5058_s5 + $0x38] sm:$0xff]  ;;  %v2543_v51 = vld [vmem:[%s5058_s5 + $0x20] sm:$0xff]  ;;  %v2541_v53 = vld [vmem:[%s5058_s5 + $0x10] sm:$0xff] }
  0x3c   : > { %3115 = vmatpush3.xpose.msk.msra.mxu0 %vm380_vm0, %v334_v5  ;;  %3186 = vmatprep.subr.mxu1 %v2546_v48  ;;  %v2542_v52 = vld [vmem:[%s5058_s5 + $0x18] sm:$0xff]  ;;  %v2540_v54 = vld [vmem:[%s5058_s5 + $0x8] sm:$0xff]  ;;  %v980_v59 = vld [vmem:[%s5056_s3] sm:$0xff]  ;;  %v3458_v5 = vmov 0.0  }
  0x3d   : > { %3116 = vmatprep.subr.msk.mxu0 %vm380_vm0, %v333_v6  ;;  %3187 = vmatpush3.xpose.msra.mxu1 %v2546_v48  ;;  %v2539_v61 = vld [vmem:[%s5058_s5] sm:$0xff]  ;;  %v3756_v1 = vrot.slane %v980_v59, %v1157_v57  ;;  %v3758_v2 = vrot.slane %v980_v59, %v1522_v58 }
  0x3e   : > { %3188 = vmatprep.subr.mxu1 %v2545_v49  ;;  %v3753_v62 = vld [vmem:[%s5055_s2] ss:$0 sm:$0xff] }
  0x40   : > { %3117 = vmatpush3.xpose.msk.msra.mxu0 %vm380_vm0, %v333_v6  ;;  %v3762_v6 = vrot.slane %v3458_v5, 7 }
  0x41   : > { %3118 = vmatprep.subr.msk.mxu0 %vm380_vm0, %v332_v7  ;;  %3189 = vmatpush3.xpose.msra.mxu1 %v2545_v49 }
  0x42   : > { %3190 = vmatprep.subr.mxu1 %v2544_v50  ;;  %5066 = vst [vmem:[#allocation6_spill] sm:$0xff] %v3762_v6 }
  0x44   : > { %3119 = vmatpush3.xpose.msk.msra.mxu0 %vm380_vm0, %v332_v7  ;;  %v3764_v7 = vrot.slane %v980_v59, %v1089_v60 }
  0x45   : > { %3120 = vmatprep.subr.msk.mxu0 %vm380_vm0, %v331_v8  ;;  %3191 = vmatpush3.xpose.msra.mxu1 %v2544_v50 }
  0x46   : > { %3192 = vmatprep.subr.mxu1 %v2543_v51 }
  0x48   : > { %3121 = vmatpush3.xpose.msk.msra.mxu0 %vm380_vm0, %v331_v8  ;;  %v1887_v8 = vsub.s32 7, %v3739_v56 }
  0x49   : > { %3122 = vmatprep.subr.msk.mxu0 %vm380_vm0, %v330_v9  ;;  %3193 = vmatpush3.xpose.msra.mxu1 %v2543_v51 }
  0x4a   : > { %3194 = vmatprep.subr.mxu1 %v2542_v52 }
  0x4c   : > { %3123 = vmatpush3.xpose.msk.msra.mxu0 %vm380_vm0, %v330_v9 }
  0x4d   : > { %3124 = vmatprep.subr.msk.mxu0 %vm380_vm0, %v329_v10  ;;  %3195 = vmatpush3.xpose.msra.mxu1 %v2542_v52 }
  0x4e   : > { %3196 = vmatprep.subr.mxu1 %v2541_v53 }
  0x50   : > { %3125 = vmatpush3.xpose.msk.msra.mxu0 %vm380_vm0, %v329_v10  ;;  %v3767_v10 = vrot.slane %v3458_v5, 1 }
  0x51   : > { %3126 = vmatprep.subr.msk.mxu0 %vm380_vm0, %v328_v11  ;;  %3197 = vmatpush3.xpose.msra.mxu1 %v2541_v53 }
  0x52   : > { %3198 = vmatprep.subr.mxu1 %v2540_v54  ;;  %5067 = vst [vmem:[#allocation7_spill] sm:$0xff] %v3767_v10 }
  0x54   : > { %3127 = vmatpush3.xpose.msk.msra.mxu0 %vm380_vm0, %v328_v11  ;;  %v3769_v11 = vrot.slane %v980_v59, %v1290_v63 }
  0x55   : > { %3128 = vmatprep.subr.msk.mxu0 %vm380_vm0, %v327_v12  ;;  %3199 = vmatpush3.xpose.msra.mxu1 %v2540_v54 }
  0x56   : > { %3200 = vmatprep.subr.mxu1 %v2539_v61 }
  0x58   : > { %3129 = vmatpush3.xpose.msk.msra.mxu0 %vm380_vm0, %v327_v12  ;;  %v1654_v12 = vsub.s32 5, %v3739_v56 }
  0x59   : > { %3130 = vmatprep.subr.msk.mxu0 %vm380_vm0, %v326_v13  ;;  %3201 = vmatpush3.xpose.msra.mxu1 %v2539_v61 }
  0x5c   : > { %3131 = vmatpush3.xpose.msk.msra.mxu0 %vm380_vm0, %v326_v13  ;;  %v1819_v13 = vsub.s32 6, %v3739_v56 }
  0x5d   : > { %3132 = vmatprep.subr.msk.mxu0 %vm380_vm0, %v325_v14 }
  0x60   : > { %3133 = vmatpush3.xpose.msk.msra.mxu0 %vm380_vm0, %v325_v14  ;;  %v1159_v14 = vmul.f32 0.0, %v3756_v1 }
  0x61   : > { %3134 = vmatprep.subr.msk.mxu0 %vm380_vm0, %v324_v15 }
  0x64   : > { %3135 = vmatpush3.xpose.msk.msra.mxu0 %vm380_vm0, %v324_v15 }
  0x65   : > { %3136 = vmatprep.subr.msk.mxu0 %vm380_vm0, %v323_v16 }
  0x68   : > { %3137 = vmatpush3.xpose.msk.msra.mxu0 %vm380_vm0, %v323_v16 }
  0x6b   : > { %3139 = vmatmul.mubr.msk.f32.vlgmr.msra.gmra.mxu0 %vm380_vm0, %v343_v17 }
  0x6c   : > { %3141 = vmatprep.mubr.msk.f32.mxu0 %vm380_vm0, %v344_v18  ;;  %v1091_v18 = vmul.f32 %v3764_v7, %v3762_v6 }
  0x6f   : > { %3142 = vmatmul.mubr.msk.f32.gmra.mxu0 %vm380_vm0, %v345_v19  ;;  %v3780_v19 = vrot.slane %v980_v59, %v1454_v3 }
  0x70   : > { %3144 = vmatprep.mubr.msk.f32.mxu0 %vm380_vm0, %v346_v20  ;;  %v3782_v20 = vrot.slane %v980_v59, %v1887_v8 }
  0x73   : > { %3145 = vmatmul.mubr.msk.f32.gmra.mxu0 %vm380_vm0, %v347_v21 }
  0x74   : > { %3147 = vmatprep.mubr.msk.f32.mxu0 %vm380_vm0, %v348_v22 }
  0x77   : > { %3148 = vmatmul.mubr.msk.f32.gmra.mxu0 %vm380_vm0, %v349_v23 }
  0x78   : > { %3150 = vmatprep.mubr.msk.f32.mxu0 %vm380_vm0, %v350_v24 }
  0x7b   : > { %3151 = vmatmul.mubr.msk.f32.gmra.mxu0 %vm380_vm0, %v351_v25 }
  0x7c   : > { %3153 = vmatprep.mubr.msk.f32.mxu0 %vm380_vm0, %v352_v26 }
  0x7f   : > { %3154 = vmatmul.mubr.msk.f32.gmra.mxu0 %vm380_vm0, %v353_v27  ;;  %v1292_v27 = vmul.f32 %v3769_v11, %v3767_v10 }
  0x80   : > { %3156 = vmatprep.mubr.msk.f32.mxu0 %vm380_vm0, %v354_v28  ;;  %v3787_v28 = vrot.slane %v980_v59, %v1654_v12 }
  0x83   : > { %3157 = vmatmul.mubr.msk.f32.gmra.mxu0 %vm380_vm0, %v355_v29  ;;  %v3789_v29 = vrot.slane %v980_v59, %v1819_v13 }
  0x84   : > { %3159 = vmatprep.mubr.msk.f32.mxu0 %vm380_vm0, %v356_v30 }
  0x87   : > { %3160 = vmatmul.mubr.msk.f32.gmra.mxu0 %vm380_vm0, %v357_v31 }
  0x88   : > { %3162 = vmatprep.mubr.msk.f32.mxu0 %vm380_vm0, %v358_v32 }
  0x8b   : > { %3163 = vmatmul.mubr.msk.f32.gmra.mxu0 %vm380_vm0, %v359_v33  ;;  %v3797_v33 = vadd.s32 8, %v3739_v56 }
  0x8c   : > { %3165 = vmatprep.mubr.msk.f32.mxu0 %vm380_vm0, %v360_v34 }
  0x8d   : > { %vm989_vm4 = vcmp.le.s32.totalorder %v3797_v33, 14 }
  0x8f   : > { %3166 = vmatmul.mubr.msk.f32.gmra.mxu0 %vm380_vm0, %v361_v35 }
  0x90   : > { %3168 = vmatprep.mubr.msk.f32.mxu0 %vm380_vm0, %v362_v36 }
  0x93   : > { %3169 = vmatmul.mubr.msk.f32.gmra.mxu0 %vm380_vm0, %v363_v37 }
  0x94   : > { %3171 = vmatprep.mubr.msk.f32.mxu0 %vm380_vm0, %v364_v38 }
  0x97   : > { %3172 = vmatmul.mubr.msk.f32.gmra.mxu0 %vm380_vm0, %v365_v39 }
  0x98   : > { %3174 = vmatprep.mubr.msk.f32.mxu0 %vm380_vm0, %v366_v40 }
  0x9b   : > { %3175 = vmatmul.mubr.msk.f32.gmra.mxu0 %vm380_vm0, %v367_v41 }
  0x9c   : > { %3177 = vmatprep.mubr.msk.f32.mxu0 %vm380_vm0, %v368_v42 }
  0x9f   : > { %3178 = vmatmul.mubr.msk.f32.gmra.mxu0 %vm380_vm0, %v369_v43 }
  0xa0   : > { %3180 = vmatprep.mubr.msk.f32.mxu0 %vm380_vm0, %v370_v44 }
  0xa3   : > { %3181 = vmatmul.mubr.msk.f32.gmra.mxu0 %vm380_vm0, %v371_v45 }
  0xa4   : > { %3183 = vmatprep.mubr.msk.f32.mxu0 %vm380_vm0, %v372_v46 }
  0xa7   : > { %3184 = vmatmul.mubr.msk.f32.gmra.mxu0 %vm380_vm0, %v373_v47 }
 0x12b   : > { %v3140_v0 = vpop.f32.mrf.mxu0 }
 0x12c   : > { %v597_v4 = vadd.f32 %v3140_v0, %v3753_v62 }
 0x12d   : > { %v591_v9 = vpop.f32.mrf.mxu0 }
 0x12e   : > { %v592_v15 = vadd.f32 %v3753_v62, %v591_v9  ;;  %v1525_v17 = vmul.f32 %v3758_v2, %v597_v4  ;;  %v1039_v21 = vrot.slane %v597_v4, 7  ;;  %v1240_v26 = vrot.slane %v597_v4, 1 }
 0x12f   : > { %v3143_v16 = vpop.f32.mrf.mxu0  ;;  %v1162_v30 = vmul.f32 %v3756_v1, %v597_v4 }
 0x130   : > { %v1023_v22 = vrot.slane %v592_v15, 7  ;;  %v1224_v23 = vrot.slane %v592_v15, 1  ;;  %v607_v24 = vadd.f32 %v3143_v16, %v3753_v62  ;;  %v1557_v34 = vadd.f32 %v1525_v17, %v1159_v14  ;;  %v3841_v16 = vld [vmem:[%s5056_s3 + $0x8] ss:$0 sm:$0xff] }
 0x131   : > { %v601_v25 = vpop.f32.mrf.mxu0  ;;  %v1161_v35 = vmul.f32 %v3756_v1, %v592_v15  ;;  %v1524_v38 = vmul.f32 %v3758_v2, %v592_v15 }
 0x132   : > { %v1056_v31 = vsel %vm1054_vm1, %v1023_v22, %v1039_v21  ;;  %v1072_v32 = vsel %vm1054_vm1, %v1039_v21, %v1023_v22  ;;  %v1257_v36 = vsel %vm1255_vm2, %v1224_v23, %v1240_v26  ;;  %v1273_v37 = vsel %vm1255_vm2, %v1240_v26, %v1224_v23 }
 0x133   : > { %v1040_v39 = vrot.slane %v607_v24, 7  ;;  %v3806_v40 = vmul.f32 %v3756_v1, %v607_v24  ;;  %v1527_v41 = vmul.f32 %v3758_v2, %v607_v24  ;;  %v3146_v42 = vpop.f32.mrf.mxu0  ;;  %v1456_v43 = vmul.f32 %v3780_v19, %v1072_v32 }
 0x134   : > { %v1457_v44 = vmul.f32 %v3780_v19, %v1056_v31  ;;  %v1241_v45 = vrot.slane %v607_v24, 1  ;;  %v602_v46 = vadd.f32 %v3753_v62, %v601_v25  ;;  %v1093_v47 = vmul.f32 %v3764_v7, %v1072_v32 }
 0x135   : > { %v1656_v48 = vmul.f32 %v3787_v28, %v1257_v36  ;;  %v1657_v49 = vmul.f32 %v3787_v28, %v1273_v37  ;;  %v1890_v50 = vmul.f32 %v3782_v20, %v607_v24  ;;  %v1094_v51 = vmul.f32 %v3764_v7, %v1056_v31  ;;  %v611_v60 = vpop.f32.mrf.mxu0 }
 0x136   : > { %v1294_v52 = vmul.f32 %v3769_v11, %v1257_v36  ;;  %v1295_v53 = vmul.f32 %v3769_v11, %v1273_v37  ;;  %v1024_v54 = vrot.slane %v602_v46, 7  ;;  %v1556_v55 = vadd.f32 %v1524_v38, %v1159_v14 }
 0x137   : > { %v1559_v57 = vadd.f32 %v1527_v41, %v1162_v30  ;;  %v1225_v58 = vrot.slane %v602_v46, 1  ;;  %v617_v59 = vadd.f32 %v3146_v42, %v3753_v62  ;;  %v1488_v61 = vadd.f32 %v1456_v43, %v1091_v18  ;;  %v3149_v23 = vpop.f32.mrf.mxu0 }
 0x138   : > { %v1489_v63 = vadd.f32 %v1457_v44, %v1091_v18  ;;  %v1057_v0 = vsel %vm1054_vm1, %v1024_v54, %v1040_v39  ;;  %v1073_v3 = vsel %vm1054_vm1, %v1040_v39, %v1024_v54  ;;  %v3825_v4 = vadd.f32 %v1656_v48, %v1292_v27 }
 0x139   : > { %v1689_v5 = vadd.f32 %v1657_v49, %v1292_v27  ;;  %v3827_v8 = vadd.f32 %v1890_v50, %v1557_v34  ;;  %v1258_v9 = vsel %vm1255_vm2, %v1225_v58, %v1241_v45  ;;  %v3832_v12 = vmul.f32 %v3756_v1, %v602_v46 }
 0x13a   : > { %v1274_v13 = vsel %vm1255_vm2, %v1241_v45, %v1225_v58  ;;  %v1526_v14 = vmul.f32 %v3758_v2, %v602_v46  ;;  %v1889_v15 = vmul.f32 %v3782_v20, %v602_v46  ;;  %v1458_v17 = vmul.f32 %v3780_v19, %v1073_v3  ;;  %v621_v45 = vpop.f32.mrf.mxu0 }
 0x13b   : > { %v1459_v18 = vmul.f32 %v3780_v19, %v1057_v0  ;;  %v1821_v21 = vmul.f32 %v3789_v29, %v1073_v3  ;;  %v1041_v22 = vrot.slane %v617_v59, 7  ;;  %v3847_v24 = vmul.f32 %v3764_v7, %v1073_v3 }
 0x13c   : > { %v1658_v25 = vmul.f32 %v3787_v28, %v1258_v9  ;;  %v3851_v26 = vmul.f32 %v3756_v1, %v617_v59  ;;  %v1242_v27 = vrot.slane %v617_v59, 1  ;;  %v1096_v30 = vmul.f32 %v3764_v7, %v1057_v0 }
 0x13d   : > { %v1296_v31 = vmul.f32 %v3769_v11, %v1258_v9  ;;  %v1659_v32 = vmul.f32 %v3787_v28, %v1274_v13  ;;  %v1853_v34 = vadd.f32 %v1821_v21, %v1488_v61  ;;  %v1297_v36 = vmul.f32 %v3769_v11, %v1274_v13 }
 0x13e   : > { %v1558_v37 = vadd.f32 %v1526_v14, %v1161_v35  ;;  %v1822_v38 = vmul.f32 %v3789_v29, %v1057_v0  ;;  %v2022_v39 = vmul.f32 %v3841_v16, %v1274_v13  ;;  %v1490_v41 = vadd.f32 %v1458_v17, %v1093_v47  ;;  %v3152_v13 = vpop.f32.mrf.mxu0 }
 0x13f   : > { %v1491_v42 = vadd.f32 %v1459_v18, %v1094_v51  ;;  %v1529_v43 = vmul.f32 %v3758_v2, %v617_v59  ;;  %v612_v44 = vadd.f32 %v3753_v62, %v611_v60  ;;  %v1690_v46 = vadd.f32 %v1658_v25, %v1294_v52 }
 0x140   : > { %v1921_v48 = vadd.f32 %v1889_v15, %v1556_v55  ;;  %v2085_v49 = vsel %vm986_vm3, %v1853_v34, 0.0  ;;  %v1892_v50 = vmul.f32 %v3782_v20, %v617_v59  ;;  %v1691_v54 = vadd.f32 %v1659_v32, %v1295_v53 }
 0x141   : > { %v1025_v35 = vrot.slane %v612_v44, 7  ;;  %v1226_v58 = vrot.slane %v612_v44, 1  ;;  %v627_v61 = vadd.f32 %v3149_v23, %v3753_v62  ;;  %v3865_v0 = vadd.f32 %v1822_v38, %v1489_v63 }
 0x142   : > { %v3868_v47 = vmul.f32 %v3841_v16, %v1258_v9  ;;  %v3870_v51 = vadd.f32 %v2022_v39, %v1689_v5  ;;  %v622_v52 = vadd.f32 %v3753_v62, %v621_v45  ;;  %v3873_v55 = vadd.f32 %v2085_v49, %v1921_v48 }
 0x143   : > { %v1561_v60 = vadd.f32 %v1529_v43, %v3806_v40  ;;  %v1058_v53 = vsel %vm1054_vm1, %v1025_v35, %v1041_v22  ;;  %v1074_v59 = vsel %vm1054_vm1, %v1041_v22, %v1025_v35  ;;  %v3880_v3 = vadd.f32 %v1892_v50, %v1559_v57 }
 0x144   : > { %5068 = vst [vmem:[#allocation8_spill] sm:$0xff] %v3870_v51  ;;  %v3883_v63 = vmul.f32 %v3756_v1, %v612_v44  ;;  %v1259_v5 = vsel %vm1255_vm2, %v1226_v58, %v1242_v27  ;;  %v1528_v9 = vmul.f32 %v3758_v2, %v612_v44  ;;  %v1275_v40 = vsel %vm1255_vm2, %v1242_v27, %v1226_v58 }
 0x145   : > { %5069 = vst [vmem:[#allocation9_spill] sm:$0xff] %v3880_v3  ;;  %v1891_v14 = vmul.f32 %v3782_v20, %v612_v44  ;;  %v1042_v15 = vrot.slane %v627_v61, 7  ;;  %v3892_v17 = vmul.f32 %v3756_v1, %v627_v61  ;;  %v1097_v57 = vmul.f32 %v3764_v7, %v1074_v59  ;;  %v631_v44 = vpop.f32.mrf.mxu0 }
 0x146   : > { %v1098_v18 = vmul.f32 %v3764_v7, %v1058_v53  ;;  %v1823_v21 = vmul.f32 %v3789_v29, %v1074_v59  ;;  %v1243_v22 = vrot.slane %v627_v61, 1  ;;  %v1298_v23 = vmul.f32 %v3769_v11, %v1259_v5 }
 0x147   : > { %v1460_v25 = vmul.f32 %v3780_v19, %v1074_v59  ;;  %v1461_v32 = vmul.f32 %v3780_v19, %v1058_v53  ;;  %v1660_v27 = vmul.f32 %v3787_v28, %v1259_v5  ;;  %v1299_v34 = vmul.f32 %v3769_v11, %v1275_v40 }
 0x148   : > { %v1661_v38 = vmul.f32 %v3787_v28, %v1275_v40  ;;  %v1824_v39 = vmul.f32 %v3789_v29, %v1058_v53  ;;  %v1855_v43 = vadd.f32 %v1823_v21, %v1490_v41  ;;  %v1560_v45 = vadd.f32 %v1528_v9, %v3832_v12 }
 0x149   : > { %v2023_v48 = vmul.f32 %v3841_v16, %v1259_v5  ;;  %v2024_v49 = vmul.f32 %v3841_v16, %v1275_v40  ;;  %v1026_v50 = vrot.slane %v622_v52, 7  ;;  %v1531_v58 = vmul.f32 %v3758_v2, %v627_v61  ;;  %v3155_v40 = vpop.f32.mrf.mxu0 }
 0x14a   : > { %v2087_v35 = vsel %vm986_vm3, %v1855_v43, 0.0  ;;  %v1894_v59 = vmul.f32 %v3782_v20, %v627_v61  ;;  %v1227_v10 = vrot.slane %v622_v52, 1  ;;  %v1492_v6 = vadd.f32 %v1460_v25, %v3847_v24 }
 0x14b   : > { %v1493_v53 = vadd.f32 %v1461_v32, %v1096_v30  ;;  %v1692_v41 = vadd.f32 %v1660_v27, %v1296_v31  ;;  %v1923_v21 = vadd.f32 %v1891_v14, %v1558_v37  ;;  %v1693_v3 = vadd.f32 %v1661_v38, %v1297_v36 }
 0x14c   : > { %v3912_v12 = vadd.f32 %v1824_v39, %v1491_v42  ;;  %v1059_v5 = vsel %vm1054_vm1, %v1026_v50, %v1042_v15  ;;  %v1075_v9 = vsel %vm1054_vm1, %v1042_v15, %v1026_v50  ;;  %v2055_v43 = vadd.f32 %v2023_v48, %v1690_v46 }
 0x14d   : > { %v2119_v51 = vadd.f32 %v2087_v35, %v1923_v21  ;;  %v1260_v61 = vsel %vm1255_vm2, %v1227_v10, %v1243_v22  ;;  %v1276_v24 = vsel %vm1255_vm2, %v1243_v22, %v1227_v10  ;;  %v3922_v30 = vadd.f32 %v2024_v49, %v1691_v54 }
 0x14e   : > { %v1563_v31 = vadd.f32 %v1531_v58, %v3851_v26  ;;  %v3925_v36 = vadd.f32 %v1894_v59, %v1561_v60  ;;  %v1167_v37 = vmul.f32 %v3756_v1, %v622_v52  ;;  %v3929_v42 = vmul.f32 %v3764_v7, %v1059_v5  ;;  %v641_v60 = vpop.f32.mrf.mxu0 }
 0x14f   : > { %v1462_v46 = vmul.f32 %v3780_v19, %v1075_v9  ;;  %v1825_v14 = vmul.f32 %v3789_v29, %v1075_v9  ;;  %v1893_v15 = vmul.f32 %v3782_v20, %v622_v52  ;;  %v1463_v25 = vmul.f32 %v3780_v19, %v1059_v5 }
 0x150   : > { %5070 = vst [vmem:[#allocation10_spill] sm:$0xff] %v3925_v36  ;;  %v1530_v10 = vmul.f32 %v3758_v2, %v622_v52  ;;  %v1662_v54 = vmul.f32 %v3787_v28, %v1260_v61  ;;  %v1663_v26 = vmul.f32 %v3787_v28, %v1276_v24  ;;  %v3938_v22 = vadd.f32 %v2119_v51, %v2055_v43 }
 0x151   : > { %v1099_v32 = vmul.f32 %v3764_v7, %v1075_v9  ;;  %v1826_v27 = vmul.f32 %v3789_v29, %v1059_v5  ;;  %v1857_v38 = vadd.f32 %v1825_v14, %v1492_v6  ;;  %v1300_v39 = vmul.f32 %v3769_v11, %v1260_v61  ;;  %v3158_v9 = vpop.f32.mrf.mxu0 }
 0x152   : > { %v1301_v48 = vmul.f32 %v3769_v11, %v1276_v24  ;;  %v637_v49 = vadd.f32 %v3152_v13, %v3753_v62  ;;  %v632_v52 = vadd.f32 %v3753_v62, %v631_v44  ;;  %v1494_v50 = vadd.f32 %v1462_v46, %v1097_v57 }
 0x153   : > { %v1925_v35 = vadd.f32 %v1893_v15, %v1560_v45  ;;  %v2025_v58 = vmul.f32 %v3841_v16, %v1260_v61  ;;  %v2089_v51 = vsel %vm986_vm3, %v1857_v38, 0.0  ;;  %v1495_v59 = vadd.f32 %v1463_v25, %v1098_v18 }
 0x154   : > { %v1562_v21 = vadd.f32 %v1530_v10, %v3883_v63  ;;  %v1694_v5 = vadd.f32 %v1662_v54, %v1298_v23  ;;  %v1695_v6 = vadd.f32 %v1663_v26, %v1299_v34  ;;  %v3950_v43 = vadd.f32 %v1826_v27, %v1493_v53 }
 0x155   : > { %v2026_v14 = vmul.f32 %v3841_v16, %v1276_v24  ;;  %v2121_v13 = vadd.f32 %v2089_v51, %v1925_v35  ;;  %v647_v44 = vadd.f32 %v3155_v40, %v3753_v62  ;;  %v1043_v57 = vrot.slane %v637_v49, 7 }
 0x156   : > { %5071 = vst [vmem:[#allocation11_spill] sm:$0xff] %v3950_v43  ;;  %v1244_v45 = vrot.slane %v637_v49, 1  ;;  %v1027_v46 = vrot.slane %v632_v52, 7  ;;  %v1228_v61 = vrot.slane %v632_v52, 1  ;;  %v2057_v15 = vadd.f32 %v2025_v58, %v1692_v41 }
 0x157   : > { %v1533_v38 = vmul.f32 %v3758_v2, %v637_v49  ;;  %v642_v18 = vadd.f32 %v3753_v62, %v641_v60  ;;  %v3957_v63 = vadd.f32 %v3158_v9, %v3753_v62  ;;  %v1896_v23 = vmul.f32 %v3782_v20, %v637_v49 }
 0x158   : > { %v1060_v34 = vsel %vm1054_vm1, %v1027_v46, %v1043_v57  ;;  %v1076_v53 = vsel %vm1054_vm1, %v1043_v57, %v1027_v46  ;;  %v1261_v40 = vsel %vm1255_vm2, %v1228_v61, %v1244_v45  ;;  %v3966_v24 = vadd.f32 %v2026_v14, %v1693_v3 }
 0x159   : > { %v3968_v41 = vadd.f32 %v2121_v13, %v2057_v15  ;;  %v1170_v25 = vmul.f32 %v3756_v1, %v637_v49  ;;  %v1532_v10 = vmul.f32 %v3758_v2, %v632_v52  ;;  %v1169_v54 = vmul.f32 %v3756_v1, %v632_v52 }
 0x15a   : > { %5072 = vst [vmem:[#allocation12_spill] sm:$0xff] %v3966_v24  ;;  %v1277_v26 = vsel %vm1255_vm2, %v1244_v45, %v1228_v61  ;;  %v1464_v60 = vmul.f32 %v3780_v19, %v1076_v53  ;;  %v1895_v27 = vmul.f32 %v3782_v20, %v632_v52  ;;  %v1565_v35 = vadd.f32 %v1533_v38, %v3892_v17  ;;  %v651_v24 = vpop.f32.mrf.mxu0 }
 0x15b   : > { %5073 = vst [vmem:[#allocation13_spill] sm:$0xff] %v3968_v41  ;;  %v1465_v3 = vmul.f32 %v3780_v19, %v1060_v34  ;;  %v1664_v58 = vmul.f32 %v3787_v28, %v1261_v40  ;;  %v1827_v51 = vmul.f32 %v3789_v29, %v1076_v53  ;;  %v3981_v49 = vadd.f32 %v1896_v23, %v1563_v31 }
 0x15c   : > { %v1101_v9 = vmul.f32 %v3764_v7, %v1076_v53  ;;  %v1102_v14 = vmul.f32 %v3764_v7, %v1060_v34  ;;  %v1302_v13 = vmul.f32 %v3769_v11, %v1261_v40  ;;  %v1303_v57 = vmul.f32 %v3769_v11, %v1277_v26 }
 0x15d   : > { %5074 = vst [vmem:[#allocation14_spill] sm:$0xff] %v3981_v49  ;;  %v1564_v45 = vadd.f32 %v1532_v10, %v1167_v37  ;;  %v1665_v52 = vmul.f32 %v3787_v28, %v1277_v26  ;;  %v1859_v17 = vadd.f32 %v1827_v51, %v1494_v50  ;;  %v1496_v46 = vadd.f32 %v1464_v60, %v1099_v32  ;;  %v3161_v51 = vpop.f32.mrf.mxu0 }
 0x15e   : > { %v1828_v61 = vmul.f32 %v3789_v29, %v1060_v34  ;;  %v1927_v15 = vadd.f32 %v1895_v27, %v1562_v21  ;;  %v2027_v38 = vmul.f32 %v3841_v16, %v1261_v40  ;;  %v1497_v31 = vadd.f32 %v1465_v3, %v3929_v42 }
 0x15f   : > { %v1696_v23 = vadd.f32 %v1664_v58, %v1300_v39  ;;  %v2028_v53 = vmul.f32 %v3841_v16, %v1277_v26  ;;  %v2091_v49 = vsel %vm986_vm3, %v1859_v17, 0.0  ;;  %v1044_v36 = vrot.slane %v647_v44, 7 }
 0x160   : > { %v1535_v37 = vmul.f32 %v3758_v2, %v647_v44  ;;  %v1028_v10 = vrot.slane %v642_v18, 7  ;;  %v1229_v50 = vrot.slane %v642_v18, 1  ;;  %v1697_v32 = vadd.f32 %v1665_v52, %v1301_v48 }
 0x161   : > { %v2123_v60 = vadd.f32 %v2091_v49, %v1927_v15  ;;  %v1245_v34 = vrot.slane %v647_v44, 1  ;;  %v1898_v21 = vmul.f32 %v3782_v20, %v647_v44  ;;  %v3996_v40 = vadd.f32 %v1828_v61, %v1495_v59 }
 0x162   : > { %v2059_v42 = vadd.f32 %v2027_v38, %v1694_v5  ;;  %v1172_v39 = vmul.f32 %v3756_v1, %v647_v44  ;;  %v1077_v26 = vsel %vm1054_vm1, %v1044_v36, %v1028_v10  ;;  %v4001_v27 = vadd.f32 %v2028_v53, %v1695_v6 }
 0x163   : > { %5075 = vst [vmem:[#allocation15_spill] sm:$0xff] %v3996_v40  ;;  %v1061_v3 = vsel %vm1054_vm1, %v1028_v10, %v1044_v36  ;;  %v4006_v58 = vmul.f32 %v3756_v1, %v642_v18  ;;  %v1262_v48 = vsel %vm1255_vm2, %v1229_v50, %v1245_v34  ;;  %v1567_v59 = vadd.f32 %v1535_v37, %v1170_v25 }
 0x164   : > { %5076 = vst [vmem:[#allocation16_spill] sm:$0xff] %v4001_v27  ;;  %v1278_v5 = vsel %vm1255_vm2, %v1245_v34, %v1229_v50  ;;  %v1466_v44 = vmul.f32 %v3780_v19, %v1077_v26  ;;  %v1534_v49 = vmul.f32 %v3758_v2, %v642_v18  ;;  %v4014_v6 = vadd.f32 %v2123_v60, %v2059_v42  ;;  %v661_v50 = vpop.f32.mrf.mxu0 }
 0x165   : > { %v4016_v52 = vadd.f32 %v1898_v21, %v1565_v35  ;;  %v1829_v36 = vmul.f32 %v3789_v29, %v1077_v26  ;;  %v1897_v17 = vmul.f32 %v3782_v20, %v642_v18  ;;  %v1103_v61 = vmul.f32 %v3764_v7, %v1077_v26 }
 0x166   : > { %5077 = vst [vmem:[#allocation17_spill] sm:$0xff] %v4014_v6  ;;  %v4022_v15 = vmul.f32 %v3764_v7, %v1061_v3  ;;  %v1467_v25 = vmul.f32 %v3780_v19, %v1061_v3  ;;  %v1666_v38 = vmul.f32 %v3787_v28, %v1262_v48  ;;  %v1667_v53 = vmul.f32 %v3787_v28, %v1278_v5 }
 0x167   : > { %5078 = vst [vmem:[#allocation18_spill] sm:$0xff] %v4016_v52  ;;  %v1830_v37 = vmul.f32 %v3789_v29, %v1061_v3  ;;  %v1861_v10 = vadd.f32 %v1829_v36, %v1496_v46  ;;  %v2029_v35 = vmul.f32 %v3841_v16, %v1262_v48  ;;  %v1304_v60 = vmul.f32 %v3769_v11, %v1262_v48 }
 0x168   : > { %v4031_v18 = vmul.f32 %v3769_v11, %v1278_v5  ;;  %v1498_v34 = vadd.f32 %v1466_v44, %v1101_v9  ;;  %v1566_v21 = vadd.f32 %v1534_v49, %v1169_v54  ;;  %v1929_v42 = vadd.f32 %v1897_v17, %v1564_v45  ;;  %v3164_v45 = vpop.f32.mrf.mxu0 }
 0x169   : > { %v2030_v26 = vmul.f32 %v3841_v16, %v1278_v5  ;;  %v2093_v52 = vsel %vm986_vm3, %v1861_v10, 0.0  ;;  %v1537_v3 = vmul.f32 %v3758_v2, %v3957_v63  ;;  %v1499_v46 = vadd.f32 %v1467_v25, %v1102_v14 }
 0x16a   : > { %v1698_v36 = vadd.f32 %v1666_v38, %v1302_v13  ;;  %v1900_v27 = vmul.f32 %v3782_v20, %v3957_v63  ;;  %v652_v48 = vadd.f32 %v3753_v62, %v651_v24  ;;  %v1699_v40 = vadd.f32 %v1667_v53, %v1303_v57 }
 0x16b   : > { %v4041_v6 = vadd.f32 %v1830_v37, %v1497_v31  ;;  %v2061_v54 = vadd.f32 %v2029_v35, %v1696_v23  ;;  %v2125_v9 = vadd.f32 %v2093_v52, %v1929_v42  ;;  %v1045_v5 = vrot.slane %v3957_v63, 7 }
 0x16c   : > { %v1174_v44 = vmul.f32 %v3756_v1, %v3957_v63  ;;  %v1029_v49 = vrot.slane %v652_v48, 7  ;;  %v1230_v17 = vrot.slane %v652_v48, 1  ;;  %v4046_v14 = vadd.f32 %v2030_v26, %v1697_v32 }
 0x16d   : > { %5079 = vst [vmem:[#allocation19_spill] sm:$0xff] %v4041_v6  ;;  %v1246_v13 = vrot.slane %v3957_v63, 1  ;;  %v1569_v25 = vadd.f32 %v1537_v3, %v1172_v39  ;;  %v667_v24 = vadd.f32 %v3161_v51, %v3753_v62  ;;  %v4050_v57 = vadd.f32 %v1900_v27, %v1567_v59 }
 0x16e   : > { %5080 = vst [vmem:[#allocation20_spill] sm:$0xff] %v4046_v14  ;;  %v1078_v31 = vsel %vm1054_vm1, %v1045_v5, %v1029_v49  ;;  %v662_v23 = vadd.f32 %v3753_v62, %v661_v50  ;;  %v4056_v52 = vadd.f32 %v3164_v45, %v3753_v62  ;;  %v4058_v38 = vadd.f32 %v2125_v9, %v2061_v54 }
 0x16f   : > { %5081 = vst [vmem:[#allocation21_spill] sm:$0xff] %v4050_v57  ;;  %v1062_v32 = vsel %vm1054_vm1, %v1029_v49, %v1045_v5  ;;  %v1263_v63 = vsel %vm1255_vm2, %v1230_v17, %v1246_v13  ;;  %v1536_v39 = vmul.f32 %v3758_v2, %v652_v48  ;;  %v1173_v27 = vmul.f32 %v3756_v1, %v652_v48 }
 0x170   : > { %5082 = vst [vmem:[#allocation22_spill] sm:$0xff] %v4058_v38  ;;  %v1279_v51 = vsel %vm1255_vm2, %v1246_v13, %v1230_v17  ;;  %v1468_v59 = vmul.f32 %v3780_v19, %v1078_v31  ;;  %v1899_v53 = vmul.f32 %v3782_v20, %v652_v48  ;;  %v1105_v37 = vmul.f32 %v3764_v7, %v1078_v31 }
 0x171   : > { %v1831_v10 = vmul.f32 %v3789_v29, %v1078_v31  ;;  %v1046_v35 = vrot.slane %v667_v24, 7  ;;  %v4073_v50 = vmul.f32 %v3756_v1, %v667_v24  ;;  %v1106_v42 = vmul.f32 %v3764_v7, %v1062_v32 }
 0x172   : > { %v1306_v26 = vmul.f32 %v3769_v11, %v1263_v63  ;;  %v1469_v3 = vmul.f32 %v3780_v19, %v1062_v32  ;;  %v1668_v54 = vmul.f32 %v3787_v28, %v1263_v63  ;;  %v1307_v9 = vmul.f32 %v3769_v11, %v1279_v51 }
 0x173   : > { %v1568_v48 = vadd.f32 %v1536_v39, %v4006_v58  ;;  %v1669_v45 = vmul.f32 %v3787_v28, %v1279_v51  ;;  %v1863_v5 = vadd.f32 %v1831_v10, %v1498_v34  ;;  %v1500_v49 = vadd.f32 %v1468_v59, %v1103_v61 }
 0x174   : > { %v1832_v17 = vmul.f32 %v3789_v29, %v1062_v32  ;;  %v1931_v13 = vadd.f32 %v1899_v53, %v1566_v21  ;;  %v2031_v31 = vmul.f32 %v3841_v16, %v1263_v63  ;;  %v2032_v57 = vmul.f32 %v3841_v16, %v1279_v51 }
 0x175   : > { %v2095_v14 = vsel %vm986_vm3, %v1863_v5, 0.0  ;;  %v1539_v6 = vmul.f32 %v3758_v2, %v667_v24  ;;  %v1030_v38 = vrot.slane %v662_v23, 7  ;;  %v1501_v43 = vadd.f32 %v1469_v3, %v4022_v15 }
 0x176   : > { %v1700_v58 = vadd.f32 %v1668_v54, %v1304_v60  ;;  %v1247_v39 = vrot.slane %v667_v24, 1  ;;  %v1231_v41 = vrot.slane %v662_v23, 1  ;;  %v2127_v34 = vadd.f32 %v2095_v14, %v1931_v13  ;;  %v671_v60 = vpop.f32.mrf.mxu0 }
 0x177   : > { %v1902_v61 = vmul.f32 %v3782_v20, %v667_v24  ;;  %v1063_v21 = vsel %vm1054_vm1, %v1030_v38, %v1046_v35  ;;  %v1079_v32 = vsel %vm1054_vm1, %v1046_v35, %v1030_v38  ;;  %v1701_v63 = vadd.f32 %v1669_v45, %v4031_v18 }
 0x178   : > { %v4095_v51 = vadd.f32 %v1832_v17, %v1499_v46  ;;  %v2063_v59 = vadd.f32 %v2031_v31, %v1698_v36  ;;  %v1264_v15 = vsel %vm1255_vm2, %v1231_v41, %v1247_v39  ;;  %v4099_v53 = vadd.f32 %v2032_v57, %v1699_v40  ;;  %v3167_v45 = vpop.f32.mrf.mxu0 }
 0x179   : > { %v1571_v14 = vadd.f32 %v1539_v6, %v1174_v44  ;;  %v4102_v24 = vmul.f32 %v3756_v1, %v662_v23  ;;  %v1280_v10 = vsel %vm1255_vm2, %v1247_v39, %v1231_v41  ;;  %v1470_v38 = vmul.f32 %v3780_v19, %v1079_v32 }
 0x17a   : > { %5083 = vst [vmem:[#allocation23_spill] sm:$0xff] %v4095_v51  ;;  %5084 = vst [vmem:[#allocation24_spill] sm:$0xff] %v4099_v53  ;;  %v1471_v18 = vmul.f32 %v3780_v19, %v1063_v21  ;;  %v1538_v46 = vmul.f32 %v3758_v2, %v662_v23  ;;  %v1670_v36 = vmul.f32 %v3787_v28, %v1264_v15 }
 0x17b   : > { %v4110_v35 = vadd.f32 %v2127_v34, %v2063_v59  ;;  %v4112_v3 = vadd.f32 %v1902_v61, %v1569_v25  ;;  %v1833_v40 = vmul.f32 %v3789_v29, %v1079_v32  ;;  %v1901_v6 = vmul.f32 %v3782_v20, %v662_v23 }
 0x17c   : > { %v1107_v44 = vmul.f32 %v3764_v7, %v1079_v32  ;;  %v1108_v41 = vmul.f32 %v3764_v7, %v1063_v21  ;;  %v1671_v57 = vmul.f32 %v3787_v28, %v1280_v10  ;;  %v1834_v54 = vmul.f32 %v3789_v29, %v1063_v21 }
 0x17d   : > { %5085 = vst [vmem:[#allocation25_spill] sm:$0xff] %v4110_v35  ;;  %5086 = vst [vmem:[#allocation26_spill] sm:$0xff] %v4112_v3  ;;  %v1308_v5 = vmul.f32 %v3769_v11, %v1264_v15  ;;  %v1309_v17 = vmul.f32 %v3769_v11, %v1280_v10  ;;  %v1865_v13 = vadd.f32 %v1833_v40, %v1500_v49 }
 0x17e   : > { %v2033_v25 = vmul.f32 %v3841_v16, %v1264_v15  ;;  %v1502_v31 = vadd.f32 %v1470_v38, %v1105_v37  ;;  %v1503_v39 = vadd.f32 %v1471_v18, %v1106_v42  ;;  %v1570_v34 = vadd.f32 %v1538_v46, %v1173_v27  ;;  %v681_v42 = vpop.f32.mrf.mxu0 }
 0x17f   : > { %v1702_v23 = vadd.f32 %v1670_v36, %v1306_v26  ;;  %v2034_v61 = vmul.f32 %v3841_v16, %v1280_v10  ;;  %v2097_v32 = vsel %vm986_vm3, %v1865_v13, 0.0  ;;  %v1541_v21 = vmul.f32 %v3758_v2, %v4056_v52 }
 0x180   : > { %v672_v59 = vadd.f32 %v3753_v62, %v671_v60  ;;  %v1703_v3 = vadd.f32 %v1671_v57, %v1307_v9  ;;  %v4129_v53 = vadd.f32 %v1834_v54, %v1501_v43  ;;  %v1933_v49 = vadd.f32 %v1901_v6, %v1568_v48 }
 0x181   : > { %v1904_v37 = vmul.f32 %v3782_v20, %v4056_v52  ;;  %v2065_v27 = vadd.f32 %v2033_v25, %v1700_v58  ;;  %v1047_v26 = vrot.slane %v4056_v52, 7  ;;  %v1178_v18 = vmul.f32 %v3756_v1, %v4056_v52 }
 0x182   : > { %5087 = vst [vmem:[#allocation27_spill] sm:$0xff] %v4129_v53  ;;  %v1031_v15 = vrot.slane %v672_v59, 7  ;;  %v1232_v10 = vrot.slane %v672_v59, 1  ;;  %v2129_v38 = vadd.f32 %v2097_v32, %v1933_v49  ;;  %v1248_v46 = vrot.slane %v4056_v52, 1 }
 0x183   : > { %v687_v9 = vadd.f32 %v3167_v45, %v3753_v62  ;;  %v4138_v43 = vadd.f32 %v2034_v61, %v1701_v63  ;;  %v1573_v48 = vadd.f32 %v1541_v21, %v4073_v50  ;;  %v682_v58 = vadd.f32 %v3753_v62, %v681_v42 }
 0x184   : > { %v1080_v60 = vsel %vm1054_vm1, %v1047_v26, %v1031_v15  ;;  %v4144_v36 = vadd.f32 %v1904_v37, %v1571_v14  ;;  %v1064_v40 = vsel %vm1054_vm1, %v1031_v15, %v1047_v26  ;;  %v1265_v6 = vsel %vm1255_vm2, %v1232_v10, %v1248_v46 }
 0x185   : > { %5088 = vst [vmem:[#allocation28_spill] sm:$0xff] %v4138_v43  ;;  %v1281_v52 = vsel %vm1255_vm2, %v1248_v46, %v1232_v10  ;;  %v1177_v63 = vmul.f32 %v3756_v1, %v672_v59  ;;  %v1472_v50 = vmul.f32 %v3780_v19, %v1080_v60  ;;  %v1540_v57 = vmul.f32 %v3758_v2, %v672_v59  ;;  %v3170_v46 = vpop.f32.mrf.mxu0 }
 0x186   : > { %5089 = vst [vmem:[#allocation29_spill] sm:$0xff] %v4144_v36  ;;  %v1903_v54 = vmul.f32 %v3782_v20, %v672_v59  ;;  %v4156_v45 = vadd.f32 %v2129_v38, %v2065_v27  ;;  %v1109_v14 = vmul.f32 %v3764_v7, %v1080_v60  ;;  %v1835_v13 = vmul.f32 %v3789_v29, %v1080_v60 }
 0x187   : > { %v1048_v25 = vrot.slane %v687_v9, 7  ;;  %v1110_v61 = vmul.f32 %v3764_v7, %v1064_v40  ;;  %v1310_v32 = vmul.f32 %v3769_v11, %v1265_v6  ;;  %v1311_v21 = vmul.f32 %v3769_v11, %v1281_v52 }
 0x188   : > { %5090 = vst [vmem:[#allocation30_spill] sm:$0xff] %v4156_v45  ;;  %v1473_v49 = vmul.f32 %v3780_v19, %v1064_v40  ;;  %v1672_v37 = vmul.f32 %v3787_v28, %v1265_v6  ;;  %v1673_v42 = vmul.f32 %v3787_v28, %v1281_v52  ;;  %v1836_v59 = vmul.f32 %v3789_v29, %v1064_v40 }
 0x189   : > { %v1867_v27 = vadd.f32 %v1835_v13, %v1502_v31  ;;  %v1504_v26 = vadd.f32 %v1472_v50, %v1107_v44  ;;  %v1572_v15 = vadd.f32 %v1540_v57, %v4102_v24  ;;  %v1935_v10 = vadd.f32 %v1903_v54, %v1570_v34  ;;  %v691_v13 = vpop.f32.mrf.mxu0 }
 0x18a   : > { %v2035_v38 = vmul.f32 %v3841_v16, %v1265_v6  ;;  %v2036_v60 = vmul.f32 %v3841_v16, %v1281_v52  ;;  %v1543_v43 = vmul.f32 %v3758_v2, %v687_v9  ;;  %v1032_v53 = vrot.slane %v682_v58, 7 }
 0x18b   : > { %v2099_v36 = vsel %vm986_vm3, %v1867_v27, 0.0  ;;  %v1505_v45 = vadd.f32 %v1473_v49, %v1108_v41  ;;  %v1906_v40 = vmul.f32 %v3782_v20, %v687_v9  ;;  %v1233_v31 = vrot.slane %v682_v58, 1 }
 0x18c   : > { %v2131_v51 = vadd.f32 %v2099_v36, %v1935_v10  ;;  %v1704_v44 = vadd.f32 %v1672_v37, %v1308_v5  ;;  %v1705_v50 = vadd.f32 %v1673_v42, %v1309_v17  ;;  %v4174_v24 = vadd.f32 %v1836_v59, %v1503_v39  ;;  %v3173_v42 = vpop.f32.mrf.mxu0 }
 0x18d   : > { %v1249_v34 = vrot.slane %v687_v9, 1  ;;  %v2067_v6 = vadd.f32 %v2035_v38, %v1702_v23  ;;  %v1180_v57 = vmul.f32 %v3756_v1, %v687_v9  ;;  %v1065_v52 = vsel %vm1054_vm1, %v1032_v53, %v1048_v25 }
 0x18e   : > { %5091 = vst [vmem:[#allocation31_spill] sm:$0xff] %v4174_v24  ;;  %v1081_v54 = vsel %vm1054_vm1, %v1048_v25, %v1032_v53  ;;  %v4181_v41 = vadd.f32 %v2036_v60, %v1703_v3  ;;  %v1575_v36 = vadd.f32 %v1543_v43, %v1178_v18  ;;  %v4189_v23 = vadd.f32 %v1906_v40, %v1573_v48 }
 0x18f   : > { %v1266_v5 = vsel %vm1255_vm2, %v1233_v31, %v1249_v34  ;;  %v1282_v17 = vsel %vm1255_vm2, %v1249_v34, %v1233_v31  ;;  %v4187_v39 = vadd.f32 %v2131_v51, %v2067_v6  ;;  %v4192_v9 = vmul.f32 %v3756_v1, %v682_v58 }
 0x190   : > { %5092 = vst [vmem:[#allocation32_spill] sm:$0xff] %v4181_v41  ;;  %5094 = vst [vmem:[#allocation34_spill] sm:$0xff] %v4189_v23  ;;  %v1542_v49 = vmul.f32 %v3758_v2, %v682_v58  ;;  %v1111_v53 = vmul.f32 %v3764_v7, %v1081_v54  ;;  %v1474_v3 = vmul.f32 %v3780_v19, %v1081_v54 }
 0x191   : > { %5093 = vst [vmem:[#allocation33_spill] sm:$0xff] %v4187_v39  ;;  %v1475_v18 = vmul.f32 %v3780_v19, %v1065_v52  ;;  %v1837_v43 = vmul.f32 %v3789_v29, %v1081_v54  ;;  %v1674_v25 = vmul.f32 %v3787_v28, %v1266_v5  ;;  %v1675_v51 = vmul.f32 %v3787_v28, %v1282_v17 }
 0x192   : > { %v1838_v48 = vmul.f32 %v3789_v29, %v1065_v52  ;;  %v1905_v37 = vmul.f32 %v3782_v20, %v682_v58  ;;  %v1112_v59 = vmul.f32 %v3764_v7, %v1065_v52  ;;  %v1312_v27 = vmul.f32 %v3769_v11, %v1266_v5 }
 0x193   : > { %v1869_v10 = vadd.f32 %v1837_v43, %v1504_v26  ;;  %v697_v38 = vadd.f32 %v3170_v46, %v3753_v62  ;;  %v1313_v60 = vmul.f32 %v3769_v11, %v1282_v17  ;;  %v1574_v40 = vadd.f32 %v1542_v49, %v1177_v63  ;;  %v701_v46 = vpop.f32.mrf.mxu0 }
 0x194   : > { %v2037_v31 = vmul.f32 %v3841_v16, %v1266_v5  ;;  %v692_v34 = vadd.f32 %v3753_v62, %v691_v13  ;;  %v1506_v6 = vadd.f32 %v1474_v3, %v1109_v14  ;;  %v1937_v54 = vadd.f32 %v1905_v37, %v1572_v15 }
 0x195   : > { %v2038_v23 = vmul.f32 %v3841_v16, %v1282_v17  ;;  %v2101_v58 = vsel %vm986_vm3, %v1869_v10, 0.0  ;;  %v1507_v52 = vadd.f32 %v1475_v18, %v1110_v61  ;;  %v1706_v41 = vadd.f32 %v1674_v25, %v1310_v32 }
 0x196   : > { %v1707_v24 = vadd.f32 %v1675_v51, %v1311_v21  ;;  %v4212_v26 = vadd.f32 %v1838_v48, %v1505_v45  ;;  %v2133_v43 = vadd.f32 %v2101_v58, %v1937_v54  ;;  %v1049_v39 = vrot.slane %v697_v38, 7 }
 0x197   : > { %v1033_v63 = vrot.slane %v692_v34, 7  ;;  %v1234_v49 = vrot.slane %v692_v34, 1  ;;  %v2069_v5 = vadd.f32 %v2037_v31, %v1704_v44  ;;  %v1250_v35 = vrot.slane %v697_v38, 1 }
 0x198   : > { %v1545_v14 = vmul.f32 %v3758_v2, %v697_v38  ;;  %v1908_v15 = vmul.f32 %v3782_v20, %v697_v38  ;;  %v4216_v13 = vadd.f32 %v2038_v23, %v1705_v50  ;;  %v707_v32 = vadd.f32 %v3173_v42, %v3753_v62  ;;  %v3176_v23 = vpop.f32.mrf.mxu0 }
 0x199   : > { %v1066_v61 = vsel %vm1054_vm1, %v1033_v63, %v1049_v39  ;;  %v1082_v45 = vsel %vm1054_vm1, %v1049_v39, %v1033_v63  ;;  %v1182_v21 = vmul.f32 %v3756_v1, %v697_v38  ;;  %v4225_v17 = vmul.f32 %v3756_v1, %v692_v34 }
 0x19a   : > { %5095 = vst [vmem:[#allocation35_spill] sm:$0xff] %v4216_v13  ;;  %v1267_v44 = vsel %vm1255_vm2, %v1234_v49, %v1250_v35  ;;  %v1283_v50 = vsel %vm1255_vm2, %v1250_v35, %v1234_v49  ;;  %v4231_v3 = vadd.f32 %v2133_v43, %v2069_v5  ;;  %v1476_v18 = vmul.f32 %v3780_v19, %v1082_v45  ;;  %v711_v58 = vpop.f32.mrf.mxu0 }
 0x19b   : > { %v1544_v39 = vmul.f32 %v3758_v2, %v692_v34  ;;  %v1907_v25 = vmul.f32 %v3782_v20, %v692_v34  ;;  %v1577_v51 = vadd.f32 %v1545_v14, %v1180_v57  ;;  %v4236_v48 = vadd.f32 %v1908_v15, %v1575_v36 }
 0x19c   : > { %v1477_v37 = vmul.f32 %v3780_v19, %v1066_v61  ;;  %v1839_v42 = vmul.f32 %v3789_v29, %v1082_v45  ;;  %v1113_v10 = vmul.f32 %v3764_v7, %v1082_v45  ;;  %v4242_v35 = vmul.f32 %v3764_v7, %v1066_v61 }
 0x19d   : > { %5096 = vst [vmem:[#allocation36_spill] sm:$0xff] %v4236_v48  ;;  %v1676_v38 = vmul.f32 %v3787_v28, %v1267_v44  ;;  %v1677_v31 = vmul.f32 %v3787_v28, %v1283_v50  ;;  %v4247_v54 = vmul.f32 %v3769_v11, %v1267_v44  ;;  %v1840_v57 = vmul.f32 %v3789_v29, %v1066_v61 }
 0x19e   : > { %v1871_v36 = vadd.f32 %v1839_v42, %v1506_v6  ;;  %v2039_v34 = vmul.f32 %v3841_v16, %v1267_v44  ;;  %v1315_v43 = vmul.f32 %v3769_v11, %v1283_v50  ;;  %v1508_v63 = vadd.f32 %v1476_v18, %v1111_v53 }
 0x19f   : > { %v1576_v49 = vadd.f32 %v1544_v39, %v4192_v9  ;;  %v1939_v5 = vadd.f32 %v1907_v25, %v1574_v40  ;;  %v4253_v14 = vadd.f32 %v1477_v37, %v1112_v59  ;;  %v2040_v15 = vmul.f32 %v3841_v16, %v1283_v50  ;;  %v3179_v59 = vpop.f32.mrf.mxu0 }
 0x1a0   : > { %v2103_v45 = vsel %vm986_vm3, %v1871_v36, 0.0  ;;  %v1547_v48 = vmul.f32 %v3758_v2, %v707_v32  ;;  %v1708_v61 = vadd.f32 %v1676_v38, %v1312_v27  ;;  %v1709_v6 = vadd.f32 %v1677_v31, %v1313_v60  ;;  %v4269_v27 = vld [vmem:[%s5055_s2] ss:$0 sm:$0xff] }
 0x1a1   : > { %v1910_v44 = vmul.f32 %v3782_v20, %v707_v32  ;;  %v702_v42 = vadd.f32 %v3753_v62, %v701_v46  ;;  %v4261_v13 = vadd.f32 %v1840_v57, %v1507_v52  ;;  %v2071_v53 = vadd.f32 %v2039_v34, %v1706_v41 }
 0x1a2   : > { %v2135_v9 = vadd.f32 %v2103_v45, %v1939_v5  ;;  %v1050_v40 = vrot.slane %v707_v32, 7  ;;  %v1184_v18 = vmul.f32 %v3756_v1, %v707_v32  ;;  %v1251_v50 = vrot.slane %v707_v32, 1 }
 0x1a3   : > { %5097 = vst [vmem:[#allocation37_spill] sm:$0xff] %v4261_v13  ;;  %v1034_v39 = vrot.slane %v702_v42, 7  ;;  %v1235_v25 = vrot.slane %v702_v42, 1  ;;  %v4264_v37 = vadd.f32 %v2040_v15, %v1707_v24  ;;  %v1579_v36 = vadd.f32 %v1547_v48, %v1182_v21 }
 0x1a4   : > { %v717_v62 = vadd.f32 %v4269_v27, %v3176_v23  ;;  %v712_v41 = vadd.f32 %v4269_v27, %v711_v58  ;;  %v4273_v60 = vadd.f32 %v1910_v44, %v1577_v51  ;;  %v2053_v46 = vadd.f32 %v3868_v47, %v3825_v4 }
 0x1a5   : > { %5098 = vst [vmem:[#allocation38_spill] sm:$0xff] %v4264_v37  ;;  %v1083_v52 = vsel %vm1054_vm1, %v1050_v40, %v1034_v39  ;;  %v4280_v24 = vadd.f32 %v4269_v27, %v3179_v59  ;;  %v4282_v32 = vadd.f32 %v2135_v9, %v2071_v53  ;;  %v1067_v21 = vsel %vm1054_vm1, %v1034_v39, %v1050_v40 }
 0x1a6   : > { %5099 = vst [vmem:[#allocation39_spill] sm:$0xff] %v4273_v60  ;;  %v1268_v23 = vsel %vm1255_vm2, %v1235_v25, %v1251_v50  ;;  %v1546_v51 = vmul.f32 %v3758_v2, %v702_v42  ;;  %v1183_v48 = vmul.f32 %v3756_v1, %v702_v42  ;;  %v1284_v38 = vsel %vm1255_vm2, %v1251_v50, %v1235_v25 }
 0x1a7   : > { %5100 = vst [vmem:[#allocation40_spill] sm:$0xff] %v4282_v32  ;;  %v1478_v4 = vmul.f32 %v3780_v19, %v1083_v52  ;;  %v1909_v47 = vmul.f32 %v3782_v20, %v702_v42  ;;  %v1115_v31 = vmul.f32 %v3764_v7, %v1083_v52  ;;  %v1841_v57 = vmul.f32 %v3789_v29, %v1083_v52 }
 0x1a8   : > { %v1051_v34 = vrot.slane %v717_v62, 7  ;;  %v4297_v58 = vmul.f32 %v3756_v1, %v717_v62  ;;  %v1116_v5 = vmul.f32 %v3764_v7, %v1067_v21  ;;  %v1316_v15 = vmul.f32 %v3769_v11, %v1268_v23 }
 0x1a9   : > { %v1479_v45 = vmul.f32 %v3780_v19, %v1067_v21  ;;  %v1678_v44 = vmul.f32 %v3787_v28, %v1268_v23  ;;  %v1317_v53 = vmul.f32 %v3769_v11, %v1284_v38  ;;  %v1578_v42 = vadd.f32 %v1546_v51, %v4225_v17 }
 0x1aa   : > { %v1679_v9 = vmul.f32 %v3787_v28, %v1284_v38  ;;  %v1873_v40 = vadd.f32 %v1841_v57, %v1508_v63  ;;  %v1510_v59 = vadd.f32 %v1478_v4, %v1113_v10  ;;  %v1842_v50 = vmul.f32 %v3789_v29, %v1067_v21 }
 0x1ab   : > { %v1941_v39 = vadd.f32 %v1909_v47, %v1576_v49  ;;  %v2041_v25 = vmul.f32 %v3841_v16, %v1268_v23  ;;  %v2042_v52 = vmul.f32 %v3841_v16, %v1284_v38  ;;  %v1549_v37 = vmul.f32 %v3758_v2, %v717_v62 }
 0x1ac   : > { %v2105_v60 = vsel %vm986_vm3, %v1873_v40, 0.0  ;;  %v1035_v13 = vrot.slane %v712_v41, 7  ;;  %v1511_v32 = vadd.f32 %v1479_v45, %v4242_v35  ;;  %v1710_v17 = vadd.f32 %v1678_v44, %v4247_v54 }
 0x1ad   : > { %v1252_v51 = vrot.slane %v717_v62, 1  ;;  %v1236_v63 = vrot.slane %v712_v41, 1  ;;  %v1711_v10 = vadd.f32 %v1679_v9, %v1315_v43  ;;  %v1912_v21 = vmul.f32 %v3782_v20, %v717_v62 }
 0x1ae   : > { %v1068_v49 = vsel %vm1054_vm1, %v1035_v13, %v1051_v34  ;;  %v1084_v16 = vsel %vm1054_vm1, %v1051_v34, %v1035_v13  ;;  %v4320_v23 = vadd.f32 %v1842_v50, %v4253_v14  ;;  %v2073_v38 = vadd.f32 %v2041_v25, %v1708_v61 }
 0x1af   : > { %v2137_v4 = vadd.f32 %v2105_v60, %v1941_v39  ;;  %v1269_v35 = vsel %vm1255_vm2, %v1236_v63, %v1252_v51  ;;  %v4324_v54 = vadd.f32 %v2042_v52, %v1709_v6  ;;  %v1581_v47 = vadd.f32 %v1549_v37, %v1184_v18 }
 0x1b0   : > { %v4327_v43 = vmul.f32 %v3756_v1, %v712_v41  ;;  %v1285_v62 = vsel %vm1255_vm2, %v1252_v51, %v1236_v63  ;;  %v1480_v57 = vmul.f32 %v3780_v19, %v1084_v16  ;;  %v1481_v13 = vmul.f32 %v3780_v19, %v1068_v49 }
 0x1b1   : > { %5101 = vst [vmem:[#allocation41_spill] sm:$0xff] %v4324_v54  ;;  %v1548_v14 = vmul.f32 %v3758_v2, %v712_v41  ;;  %v1680_v61 = vmul.f32 %v3787_v28, %v1269_v35  ;;  %v4335_v60 = vadd.f32 %v1912_v21, %v1579_v36  ;;  %v1681_v6 = vmul.f32 %v3787_v28, %v1285_v62  ;;  %v4352_v36 = vld [vmem:[%s5057_s4] ss:$0 sm:$0xff] }
 0x1b2   : > { %v1843_v18 = vmul.f32 %v3789_v29, %v1084_v16  ;;  %v1911_v37 = vmul.f32 %v3782_v20, %v712_v41  ;;  %v4340_v34 = vadd.f32 %v2137_v4, %v2073_v38  ;;  %v4343_v45 = vmul.f32 %v3764_v7, %v1084_v16  ;;  %v5104_v4 = vld [vmem:[#allocation8_spill] sm:$0xff] }
 0x1b3   : > { %5102 = vst [vmem:[#allocation42_spill] sm:$0xff] %v4335_v60  ;;  %v4346_v44 = vmul.f32 %v3764_v7, %v1068_v49  ;;  %v1844_v9 = vmul.f32 %v3789_v29, %v1068_v49  ;;  %v4355_v40 = vmul.f32 %v3769_v11, %v1269_v35  ;;  %v4358_v41 = vmul.f32 %v3769_v11, %v1285_v62  ;;  %v4372_v49 = vld [vmem:[%s5056_s3 + $0x8] ss:$0 sm:$0xff]  ;;  %v5115_v60 = vld [vmem:[#allocation10_spill] sm:$0xff] }
 0x1b4   : > { %v1875_v50 = vadd.f32 %v1843_v18, %v1510_v59  ;;  %v2181_v39 = vadd.f32 %v3873_v55, %v2053_v46  ;;  %v1512_v25 = vadd.f32 %v1480_v57, %v1115_v31  ;;  %v4361_v52 = vadd.f32 %v1481_v13, %v1116_v5  ;;  %v721_v46 = vpop.f32.mrf.mxu0 }
 0x1b5   : > { %v4363_v51 = vadd.f32 %v1548_v14, %v1183_v48  ;;  %v4365_v63 = vadd.f32 %v1680_v61, %v1316_v15  ;;  %v4367_v21 = vadd.f32 %v1681_v6, %v1317_v53  ;;  %v2043_v16 = vmul.f32 %v4372_v49, %v1269_v35 }
 0x1b6   : > { %v2107_v59 = vsel %vm986_vm3, %v1875_v50, 0.0  ;;  %v2219_v55 = vadd.f32 %v4352_v36, %v2181_v39  ;;  %v4378_v31 = vadd.f32 %v1844_v9, %v1511_v32  ;;  %v1943_v48 = vadd.f32 %v1911_v37, %v1578_v42  ;;  %v3182_v9 = vpop.f32.mrf.mxu0 }
 0x1b7   : > { %v2118_v5 = vadd.f32 %v3827_v8, %v3865_v0  ;;  %v2044_v15 = vmul.f32 %v4372_v49, %v1285_v62  ;;  %v1551_v38 = vmul.f32 %v3758_v2, %v4280_v24  ;;  %v2150_v35 = vsel %vm989_vm4, %v5104_v4, 0.0 }
 0x1b8   : > { %5103 = vst [vmem:[#allocation43_spill] sm:$0xff] %v4378_v31  ;;  %v2283_v53 = vmul.f32 0.044715, %v2219_v55  ;;  %v2139_v57 = vadd.f32 %v2107_v59, %v1943_v48  ;;  %v1914_v32 = vmul.f32 %v3782_v20, %v4280_v24  ;;  %v722_v13 = vadd.f32 %v4269_v27, %v721_v46 }
 0x1b9   : > { %v2182_v42 = vadd.f32 %v2150_v35, %v2118_v5  ;;  %v2075_v14 = vadd.f32 %v2043_v16, %v1710_v17  ;;  %v1052_v8 = vrot.slane %v4280_v24, 7  ;;  %v4395_v0 = vmul.f32 %v3756_v1, %v4280_v24 }
 0x1ba   : > { %v2315_v61 = vmul.f32 %v2283_v53, %v2219_v55  ;;  %v1253_v62 = vrot.slane %v4280_v24, 1  ;;  %v1036_v18 = vrot.slane %v722_v13, 7  ;;  %v1237_v37 = vrot.slane %v722_v13, 1 }
 0x1bb   : > { %v2220_v6 = vadd.f32 %v4352_v36, %v2182_v42  ;;  %v4399_v50 = vadd.f32 %v2044_v15, %v1711_v10  ;;  %v4401_v39 = vmul.f32 0.5, %v2219_v55  ;;  %v4404_v17 = vadd.f32 %v1551_v38, %v4297_v58 }
 0x1bc   : > { %v2347_v59 = vmul.f32 %v2315_v61, %v2219_v55  ;;  %v4406_v16 = vadd.f32 %v2139_v57, %v2075_v14  ;;  %v4408_v46 = vadd.f32 %v1914_v32, %v1581_v47  ;;  %v2221_v24 = vadd.f32 %v4352_v36, %v3938_v22  ;;  %v5108_v22 = vld [vmem:[#allocation9_spill] sm:$0xff] }
 0x1bd   : > { %5105 = vst [vmem:[#allocation8_spill] sm:$0xff] %v4399_v50  ;;  %v2284_v48 = vmul.f32 0.044715, %v2220_v6  ;;  %v1069_v53 = vsel %vm1054_vm1, %v1036_v18, %v1052_v8  ;;  %v4416_v10 = vsel %vm1054_vm1, %v1052_v8, %v1036_v18  ;;  %v4419_v15 = vadd.f32 %v4269_v27, %v3182_v9  ;;  %v731_v50 = vpop.f32.mrf.mxu0 }
 0x1be   : > { %5106 = vst [vmem:[#allocation44_spill] sm:$0xff] %v4406_v16  ;;  %5107 = vst [vmem:[#allocation45_spill] sm:$0xff] %v4408_v46  ;;  %v2379_v5 = vadd.f32 %v2347_v59, %v2219_v55  ;;  %v4422_v38 = vmul.f32 %v3756_v1, %v722_v13  ;;  %v1270_v47 = vsel %vm1255_vm2, %v1237_v37, %v1253_v62  ;;  %v4437_v18 = vmul.f32 0.5, %v2220_v6 }
 0x1bf   : > { %v2316_v58 = vmul.f32 %v2284_v48, %v2220_v6  ;;  %v2120_v55 = vadd.f32 %v5108_v22, %v3912_v12  ;;  %v1286_v35 = vsel %vm1255_vm2, %v1253_v62, %v1237_v37  ;;  %v1550_v57 = vmul.f32 %v3758_v2, %v722_v13 }
 0x1c0   : > { %v2411_v4 = vmul.f32 0.7978846, %v2379_v5  ;;  %v1913_v32 = vmul.f32 %v3782_v20, %v722_v13  ;;  %v1482_v14 = vmul.f32 %v3780_v19, %v4416_v10  ;;  %v1483_v61 = vmul.f32 %v3780_v19, %v1069_v53 }
 0x1c1   : > { %v2348_v42 = vmul.f32 %v2316_v58, %v2220_v6  ;;  %v1845_v8 = vmul.f32 %v3789_v29, %v4416_v10  ;;  %v1682_v12 = vmul.f32 %v3787_v28, %v1270_v47  ;;  %v4440_v9 = vmul.f32 0.5, %v2221_v24 }
 0x1c2   : > { %3308 = vtanh.f32 %v2411_v4  ;;  %v4443_v37 = vmul.f32 %v3764_v7, %v1069_v53  ;;  %v4446_v13 = vmul.f32 %v3769_v11, %v1270_v47  ;;  %v4449_v48 = vmul.f32 %v3769_v11, %v1286_v35 }
 0x1c3   : > { %v2380_v62 = vadd.f32 %v2348_v42, %v2220_v6  ;;  %v1877_v59 = vadd.f32 %v1845_v8, %v1512_v25  ;;  %v4452_v5 = vadd.f32 %v1550_v57, %v4327_v43  ;;  %v1683_v58 = vmul.f32 %v3787_v28, %v1286_v35 }
 0x1c4   : > { %v2285_v22 = vmul.f32 0.044715, %v2221_v24  ;;  %v1514_v46 = vadd.f32 %v1482_v14, %v4343_v45  ;;  %v4457_v6 = vadd.f32 %v1483_v61, %v4346_v44  ;;  %v1846_v42 = vmul.f32 %v3789_v29, %v1069_v53 }
 0x1c5   : > { %v2412_v4 = vmul.f32 0.7978846, %v2380_v62  ;;  %v4461_v25 = vadd.f32 %v1682_v12, %v4355_v40  ;;  %v1945_v8 = vadd.f32 %v1913_v32, %v4363_v51  ;;  %v2109_v43 = vsel %vm986_vm3, %v1877_v59, 0.0 }
 0x1c6   : > { %v2317_v57 = vmul.f32 %v2285_v22, %v2221_v24  ;;  %v2045_v62 = vmul.f32 %v4372_v49, %v1270_v47  ;;  %v2046_v45 = vmul.f32 %v4372_v49, %v1286_v35  ;;  %v2152_v44 = vsel %vm989_vm4, %v3922_v30, 0.0  ;;  %v5110_v35 = vld [vmem:[#allocation13_spill] sm:$0xff] }
 0x1c7   : > { %3310 = vtanh.f32 %v2412_v4  ;;  %v4472_v53 = vadd.f32 %v1683_v58, %v4358_v41  ;;  %v2184_v14 = vadd.f32 %v2152_v44, %v2120_v55  ;;  %v4475_v51 = vadd.f32 %v4269_v27, %v731_v50  ;;  %v3185_v58 = vpop.f32.mrf.mxu0 }
 0x1c8   : > { %v2349_v40 = vmul.f32 %v2317_v57, %v2221_v24  ;;  %v4478_v32 = vadd.f32 %v1846_v42, %v4361_v52  ;;  %v2141_v61 = vadd.f32 %v2109_v43, %v1945_v8  ;;  %v1916_v47 = vmul.f32 %v3782_v20, %v4419_v15 }
 0x1c9   : > { %v2223_v12 = vadd.f32 %v4352_v36, %v5110_v35  ;;  %v1053_v30 = vrot.slane %v4419_v15, 7  ;;  %v2222_v41 = vadd.f32 %v4352_v36, %v2184_v14  ;;  %v1037_v55 = vrot.slane %v4475_v51, 7 }
 0x1ca   : > { %5109 = vst [vmem:[#allocation9_spill] sm:$0xff] %v4478_v32  ;;  %v2381_v59 = vadd.f32 %v2349_v40, %v2221_v24  ;;  %v2077_v50 = vadd.f32 %v2045_v62, %v4365_v63  ;;  %v4489_v52 = vadd.f32 %v2046_v45, %v4367_v21  ;;  %v1254_v22 = vrot.slane %v4419_v15, 1 }
 0x1cb   : > { %v1238_v4 = vrot.slane %v4475_v51, 1  ;;  %v1553_v24 = vmul.f32 %v3758_v2, %v4419_v15  ;;  %v2286_v8 = vmul.f32 0.044715, %v2222_v41  ;;  %v2287_v43 = vmul.f32 0.044715, %v2223_v12 }
 0x1cc   : > { %5111 = vst [vmem:[#allocation13_spill] sm:$0xff] %v4489_v52  ;;  %v2413_v42 = vmul.f32 0.7978846, %v2381_v59  ;;  %v4495_v57 = vadd.f32 %v2141_v61, %v2077_v50  ;;  %v4498_v44 = vadd.f32 %v1916_v47, %v4404_v17  ;;  %v4502_v63 = vsel %vm1054_vm1, %v1053_v30, %v1037_v55 }
 0x1cd   : > { %v4505_v21 = vadd.f32 %v4269_v27, %v3185_v58  ;;  %v2318_v62 = vmul.f32 %v2286_v8, %v2222_v41  ;;  %v1070_v45 = vsel %vm1054_vm1, %v1037_v55, %v1053_v30  ;;  %v1190_v40 = vmul.f32 %v3756_v1, %v4419_v15 }
 0x1ce   : > { %5112 = vst [vmem:[#allocation46_spill] sm:$0xff] %v4495_v57  ;;  %5113 = vst [vmem:[#allocation47_spill] sm:$0xff] %v4498_v44  ;;  %3312 = vtanh.f32 %v2413_v42  ;;  %v1271_v17 = vsel %vm1255_vm2, %v1238_v4, %v1254_v22  ;;  %v4515_v61 = vmul.f32 %v3758_v2, %v4475_v51  ;;  %v1847_v47 = vmul.f32 %v3789_v29, %v4502_v63 }
 0x1cf   : > { %v3309_v14 = vpop.eup %3308  ;;  %v1915_v35 = vmul.f32 %v3782_v20, %v4475_v51  ;;  %v2350_v58 = vmul.f32 %v2318_v62, %v2222_v41  ;;  %v4523_v30 = vsel %vm1255_vm2, %v1254_v22, %v1238_v4  ;;  %v2319_v15 = vmul.f32 %v2287_v43, %v2223_v12 }
 0x1d0   : > { %v2475_v59 = vadd.f32 1.0, %v3309_v14  ;;  %v4525_v55 = vmul.f32 0.5, %v2222_v41  ;;  %v4528_v50 = vmul.f32 %v3780_v19, %v1070_v45  ;;  %v1879_v42 = vadd.f32 %v1847_v47, %v1514_v46 }
 0x1d1   : > { %v4530_v8 = vmul.f32 0.5, %v2223_v12  ;;  %v2382_v52 = vadd.f32 %v2350_v58, %v2222_v41  ;;  %v4534_v32 = vmul.f32 %v3787_v28, %v1271_v17  ;;  %v2351_v62 = vmul.f32 %v2319_v15, %v2223_v12  ;;  %v741_v58 = vpop.f32.mrf.mxu0 }
 0x1d2   : > { %v2507_v44 = vmul.f32 %v2475_v59, %v4401_v39  ;;  %v4538_v22 = vmul.f32 %v3787_v28, %v4523_v30  ;;  %v1947_v4 = vadd.f32 %v1915_v35, %v4452_v5  ;;  %v2111_v43 = vsel %vm986_vm3, %v1879_v42, 0.0  ;;  %v5114_v35 = vld [vmem:[#allocation11_spill] sm:$0xff] }
 0x1d3   : > { %v1555_v46 = vmul.f32 %v3758_v2, %v4505_v21  ;;  %v2414_v39 = vmul.f32 0.7978846, %v2382_v52  ;;  %v1848_v41 = vmul.f32 %v3789_v29, %v1070_v45  ;;  %v2047_v47 = vmul.f32 %v4372_v49, %v1271_v17 }
 0x1d4   : > { %v3311_v14 = vpop.eup %3310  ;;  %3202 = vmatprep.mubr.f32.mxu1 %v2507_v44  ;;  %v2383_v59 = vadd.f32 %v2351_v62, %v2223_v12  ;;  %v2048_v57 = vmul.f32 %v4372_v49, %v4523_v30  ;;  %v2143_v5 = vadd.f32 %v2111_v43, %v1947_v4  ;;  %v2122_v42 = vadd.f32 %v5115_v60, %v5114_v35  ;;  %v5116_v12 = vld [vmem:[#allocation12_spill] sm:$0xff] }
 0x1d5   : > { %v2476_v15 = vadd.f32 1.0, %v3311_v14  ;;  %3314 = vtanh.f32 %v2414_v39  ;;  %v1587_v16 = vadd.f32 %v1555_v46, %v1190_v40  ;;  %v1918_v52 = vmul.f32 %v3782_v20, %v4505_v21 }
 0x1d6   : > { %v2415_v31 = vmul.f32 0.7978846, %v2383_v59  ;;  %v4555_v54 = vmul.f32 0.0, %v3782_v20  ;;  %v2154_v62 = vsel %vm989_vm4, %v5116_v12, 0.0  ;;  %v742_v4 = vadd.f32 %v4269_v27, %v741_v58 }
 0x1d7   : > { %v2508_v44 = vmul.f32 %v2476_v15, %v4437_v18  ;;  %v2079_v43 = vadd.f32 %v2047_v47, %v4461_v25  ;;  %v1585_v60 = vadd.f32 %v1553_v24, %v4395_v0  ;;  %v2186_v40 = vadd.f32 %v2154_v62, %v2122_v42 }
 0x1d8   : > { %3316 = vtanh.f32 %v2415_v31  ;;  %v4564_v46 = vadd.f32 %v1848_v41, %v4457_v6  ;;  %v4567_v18 = vadd.f32 %v2048_v57, %v4472_v53  ;;  %v1419_v14 = vrot.slane %v4505_v21, 7 }
 0x1d9   : > { %3203 = vmatmul.mubr.f32.vlgmr.msra.gmra.mxu1 %v2508_v44  ;;  %v1619_v39 = vrot.slane %v4505_v21, 1  ;;  %v4571_v59 = vadd.f32 %v2143_v5, %v2079_v43  ;;  %v4573_v27 = vadd.f32 %v1918_v52, %v1585_v60  ;;  %v2224_v31 = vadd.f32 %v4352_v36, %v2186_v40  ;;  %v5117_v43 = vld [vmem:[#allocation6_spill] sm:$0xff] }
 0x1da   : > { %v1403_v25 = vrot.slane %v742_v4, 7  ;;  %v4577_v24 = vadd.f32 %v4555_v54, %v1587_v16  ;;  %v1119_v6 = vmul.f32 %v3764_v7, %v4416_v10  ;;  %v1121_v53 = vmul.f32 %v3764_v7, %v4502_v63 }
 0x1db   : > { %v3313_v0 = vpop.eup %3312  ;;  %v1603_v57 = vrot.slane %v742_v4, 1  ;;  %v2288_v21 = vmul.f32 0.044715, %v2224_v31  ;;  %v1122_v47 = vmul.f32 %v3764_v7, %v1070_v45  ;;  %v1189_v15 = vmul.f32 %v3756_v1, %v4475_v51 }
 0x1dc   : > { %v2477_v41 = vadd.f32 1.0, %v3313_v0  ;;  %v1435_v58 = vsel %vm1054_vm1, %v1403_v25, %v1419_v14  ;;  %v1322_v16 = vmul.f32 %v3769_v11, %v1271_v17  ;;  %v1451_v5 = vsel %vm1054_vm1, %v1419_v14, %v1403_v25 }
 0x1dd   : > { %v1484_v10 = vmul.f32 %v3780_v19, %v4502_v63  ;;  %v2320_v42 = vmul.f32 %v2288_v21, %v2224_v31  ;;  %v1486_v52 = vmul.f32 %v3780_v19, %v1451_v5  ;;  %v1635_v7 = vsel %vm1255_vm2, %v1603_v57, %v1619_v39 }
 0x1de   : > { %v2509_v35 = vmul.f32 %v2477_v41, %v4440_v9  ;;  %v1487_v45 = vmul.f32 %v3780_v19, %v1435_v58  ;;  %v1554_v1 = vmul.f32 %v3758_v2, %v742_v4  ;;  %v1651_v51 = vsel %vm1255_vm2, %v1619_v39, %v1603_v57 }
 0x1df   : > { %v1686_v17 = vmul.f32 %v3787_v28, %v1635_v7  ;;  %v2352_v44 = vmul.f32 %v2320_v42, %v2224_v31  ;;  %v1323_v9 = vmul.f32 %v3769_v11, %v4523_v30  ;;  %v1687_v63 = vmul.f32 %v3787_v28, %v1651_v51 }
 0x1e0   : > { %3205 = vmatprep.mubr.f32.mxu1 %v2509_v35  ;;  %v1849_v12 = vmul.f32 %v3789_v29, %v1451_v5  ;;  %v1517_v62 = vadd.f32 %v4528_v50, %v4443_v37  ;;  %v1518_v19 = vadd.f32 %v1486_v52, %v1121_v53  ;;  %v1850_v2 = vmul.f32 %v3789_v29, %v1435_v58  ;;  %v5119_v35 = vld [vmem:[#allocation17_spill] sm:$0xff] }
 0x1e1   : > { %v1851_v60 = vmul.f32 %v3789_v29, %v5117_v43  ;;  %v2384_v40 = vadd.f32 %v2352_v44, %v2224_v31  ;;  %v1516_v14 = vadd.f32 %v1484_v10, %v1119_v6  ;;  %v1584_v39 = vadd.f32 %v4515_v61, %v4422_v38 }
 0x1e2   : > { %v1716_v11 = vadd.f32 %v4534_v32, %v4446_v13  ;;  %v3315_v28 = vpop.eup %3314  ;;  %v1519_v30 = vadd.f32 %v1487_v45, %v1122_v47  ;;  %v1586_v25 = vadd.f32 %v1554_v1, %v1189_v15  ;;  %v1718_v0 = vadd.f32 %v1686_v17, %v1322_v16  ;;  %v5118_v32 = vld [vmem:[#allocation7_spill] sm:$0xff]  ;;  %v5122_v17 = vld [vmem:[#allocation16_spill] sm:$0xff] }
 0x1e3   : > { %v1917_v37 = vmul.f32 %v3782_v20, %v742_v4  ;;  %v2478_v50 = vadd.f32 1.0, %v3315_v28  ;;  %v2416_v53 = vmul.f32 0.7978846, %v2384_v40  ;;  %v1719_v57 = vadd.f32 %v1687_v63, %v1323_v9  ;;  %v5123_v9 = vld [vmem:[#allocation22_spill] sm:$0xff]  ;;  %v5128_v28 = vld [vmem:[#allocation23_spill] sm:$0xff] }
 0x1e4   : > { %v1881_v41 = vadd.f32 %v1849_v12, %v1516_v14  ;;  %v1882_v29 = vadd.f32 %v1850_v2, %v1517_v62  ;;  %v1883_v58 = vadd.f32 %v1851_v60, %v1518_v19  ;;  %v2049_v6 = vmul.f32 %v4372_v49, %v1635_v7  ;;  %v5125_v63 = vld [vmem:[#allocation18_spill] sm:$0xff]  ;;  %v5126_v2 = vld [vmem:[#allocation20_spill] sm:$0xff] }
 0x1e5   : > { %v3317_v21 = vpop.eup %3316  ;;  %v2050_v38 = vmul.f32 %v4372_v49, %v1651_v51  ;;  %v2510_v61 = vmul.f32 %v2478_v50, %v4525_v55  ;;  %3318 = vtanh.f32 %v2416_v53  ;;  %v2051_v47 = vmul.f32 %v4372_v49, %v5118_v32 }
 0x1e6   : > { %v2479_v13 = vadd.f32 1.0, %v3317_v21  ;;  %v4621_v15 = vmul.f32 0.5, %v2224_v31  ;;  %v1717_v20 = vadd.f32 %v4538_v22, %v4449_v48  ;;  %v1884_v4 = vadd.f32 %v1851_v60, %v1519_v30  ;;  %v5120_v48 = vld [vmem:[#allocation15_spill] sm:$0xff]  ;;  %v5121_v22 = vld [vmem:[#allocation14_spill] sm:$0xff]  ;;  %v5127_v60 = vld [vmem:[#allocation25_spill] sm:$0xff] }
 0x1e7   : > { %v1951_v16 = vadd.f32 %v4555_v54, %v1586_v25  ;;  %3206 = vmatmul.mubr.f32.gmra.mxu1 %v2510_v61  ;;  %v1949_v10 = vadd.f32 %v1917_v37, %v1584_v39  ;;  %v2113_v55 = vsel %vm986_vm3, %v1881_v41, 0.0  ;;  %v2225_v42 = vadd.f32 %v4352_v36, %v5119_v35  ;;  %v5129_v30 = vld [vmem:[#allocation21_spill] sm:$0xff]  ;;  %v5130_v21 = vld [vmem:[#allocation24_spill] sm:$0xff] }
 0x1e8   : > { %v2511_v5 = vmul.f32 %v2479_v13, %v4530_v8  ;;  %v2081_v52 = vadd.f32 %v2049_v6, %v1716_v11  ;;  %v2115_v49 = vsel %vm986_vm3, %v1883_v58, 0.0  ;;  %v2146_v31 = vadd.f32 %v4573_v27, %v1882_v29  ;;  %v5124_v27 = vld [vmem:[#allocation19_spill] sm:$0xff]  ;;  %v5131_v58 = vld [vmem:[#allocation30_spill] sm:$0xff] }
 0x1e9   : > { %v2124_v7 = vadd.f32 %v5121_v22, %v5120_v48  ;;  %v2082_v54 = vadd.f32 %v2050_v38, %v1717_v20  ;;  %v4636_v45 = vadd.f32 %v2051_v47, %v1718_v0  ;;  %v4638_v8 = vadd.f32 %v2051_v47, %v1719_v57 }
 0x1ea   : > { %3208 = vmatprep.mubr.f32.mxu1 %v2511_v5  ;;  %v2289_v1 = vmul.f32 0.044715, %v2225_v42  ;;  %v2145_v51 = vadd.f32 %v2113_v55, %v1949_v10  ;;  %v2156_v44 = vsel %vm989_vm4, %v5122_v17, 0.0  ;;  %v4645_v56 = vadd.f32 %v4352_v36, %v5123_v9 }
 0x1eb   : > { %v2126_v12 = vadd.f32 %v5125_v63, %v5124_v27  ;;  %v2188_v19 = vadd.f32 %v2156_v44, %v2124_v7  ;;  %v2158_v43 = vsel %vm989_vm4, %v5126_v2, 0.0  ;;  %v4654_v40 = vadd.f32 %v4352_v36, %v5127_v60  ;;  %v5132_v2 = vld [vmem:[#allocation27_spill] sm:$0xff] }
 0x1ec   : > { %v2321_v62 = vmul.f32 %v2289_v1, %v2225_v42  ;;  %v4656_v14 = vadd.f32 %v2115_v49, %v1951_v16  ;;  %v2291_v39 = vmul.f32 0.044715, %v4645_v56  ;;  %v2128_v25 = vadd.f32 %v5129_v30, %v5128_v28 }
 0x1ed   : > { %v2190_v11 = vadd.f32 %v2158_v43, %v2126_v12  ;;  %v2178_v0 = vsel %vm989_vm4, %v2082_v54, 0.0  ;;  %v4664_v50 = vadd.f32 %v4352_v36, %v2188_v19  ;;  %v2293_v53 = vmul.f32 0.044715, %v4654_v40 }
 0x1ee   : > { %v2353_v37 = vmul.f32 %v2321_v62, %v2225_v42  ;;  %v2323_v57 = vmul.f32 %v2291_v39, %v4645_v56  ;;  %v2160_v29 = vsel %vm989_vm4, %v5130_v21, 0.0  ;;  %v4676_v6 = vadd.f32 %v4352_v36, %v5131_v58  ;;  %v5137_v21 = vld [vmem:[#allocation29_spill] sm:$0xff]  ;;  %v5138_v58 = vld [vmem:[#allocation32_spill] sm:$0xff] }
 0x1ef   : > { %v4669_v41 = vadd.f32 %v4352_v36, %v2190_v11  ;;  %v4679_v38 = vadd.f32 %v4577_v24, %v1884_v4  ;;  %v2290_v13 = vmul.f32 0.044715, %v4664_v50  ;;  %v2325_v32 = vmul.f32 %v2293_v53, %v4654_v40  ;;  %v5134_v11 = vld [vmem:[#allocation28_spill] sm:$0xff] }
 0x1f0   : > { %v2385_v61 = vadd.f32 %v2353_v37, %v2225_v42  ;;  %v2209_v47 = vadd.f32 %v2145_v51, %v2081_v52  ;;  %v2355_v20 = vmul.f32 %v2323_v57, %v4645_v56  ;;  %v2192_v5 = vadd.f32 %v2160_v29, %v2128_v25  ;;  %v5136_v57 = vld [vmem:[#allocation31_spill] sm:$0xff] }
 0x1f1   : > { %v2292_v16 = vmul.f32 0.044715, %v4669_v41  ;;  %v4685_v10 = vadd.f32 %v2178_v0, %v2146_v31  ;;  %v2322_v35 = vmul.f32 %v2290_v13, %v4664_v50  ;;  %v2357_v49 = vmul.f32 %v2325_v32, %v4654_v40  ;;  %v5135_v0 = vld [vmem:[#allocation33_spill] sm:$0xff] }
 0x1f2   : > { %v2417_v55 = vmul.f32 0.7978846, %v2385_v61  ;;  %v3319_v24 = vpop.eup %3318  ;;  %v2387_v4 = vadd.f32 %v2355_v20, %v4645_v56  ;;  %v4692_v22 = vadd.f32 %v4352_v36, %v2192_v5  ;;  %v2295_v52 = vmul.f32 0.044715, %v4676_v6 }
 0x1f3   : > { %v2324_v48 = vmul.f32 %v2292_v16, %v4669_v41  ;;  %v2480_v7 = vadd.f32 1.0, %v3319_v24  ;;  %v2354_v31 = vmul.f32 %v2322_v35, %v4664_v50  ;;  %v2389_v54 = vadd.f32 %v2357_v49, %v4654_v40 }
 0x1f4   : > { %3320 = vtanh.f32 %v2417_v55  ;;  %v4697_v1 = vmul.f32 0.5, %v2225_v42  ;;  %v2419_v51 = vmul.f32 0.7978846, %v2387_v4  ;;  %v2294_v44 = vmul.f32 0.044715, %v4692_v22  ;;  %v5133_v42 = vld [vmem:[#allocation26_spill] sm:$0xff] }
 0x1f5   : > { %v2356_v17 = vmul.f32 %v2324_v48, %v4669_v41  ;;  %v2512_v9 = vmul.f32 %v2480_v7, %v4621_v15  ;;  %v2386_v27 = vadd.f32 %v2354_v31, %v4664_v50  ;;  %v2421_v63 = vmul.f32 0.7978846, %v2389_v54  ;;  %v5139_v4 = vld [vmem:[#allocation34_spill] sm:$0xff]  ;;  %v5140_v54 = vld [vmem:[#allocation35_spill] sm:$0xff] }
 0x1f6   : > { %v2327_v12 = vmul.f32 %v2295_v52, %v4676_v6  ;;  %3322 = vtanh.f32 %v2419_v51  ;;  %v2326_v19 = vmul.f32 %v2294_v44, %v4692_v22  ;;  %v2130_v43 = vadd.f32 %v5133_v42, %v5132_v2 }
 0x1f7   : > { %v2388_v62 = vadd.f32 %v2356_v17, %v4669_v41  ;;  %3209 = vmatmul.mubr.f32.gmra.mxu1 %v2512_v9  ;;  %v2418_v60 = vmul.f32 0.7978846, %v2386_v27  ;;  %3324 = vtanh.f32 %v2421_v63  ;;  %v2162_v15 = vsel %vm989_vm4, %v5134_v11, 0.0 }
 0x1f8   : > { %v2359_v39 = vmul.f32 %v2327_v12, %v4676_v6  ;;  %v2358_v30 = vmul.f32 %v2326_v19, %v4692_v22  ;;  %v2194_v25 = vadd.f32 %v2162_v15, %v2130_v43  ;;  %v4715_v37 = vadd.f32 %v4352_v36, %v5135_v0 }
 0x1f9   : > { %v2420_v28 = vmul.f32 0.7978846, %v2388_v62  ;;  %3326 = vtanh.f32 %v2418_v60  ;;  %v2132_v29 = vadd.f32 %v5137_v21, %v5136_v57  ;;  %v2164_v61 = vsel %vm989_vm4, %v5138_v58, 0.0  ;;  %v5141_v62 = vld [vmem:[#allocation40_spill] sm:$0xff] }
 0x1fa   : > { %v2391_v53 = vadd.f32 %v2359_v39, %v4676_v6  ;;  %v4724_v13 = vadd.f32 %v4352_v36, %v2209_v47  ;;  %v2390_v32 = vadd.f32 %v2358_v30, %v4692_v22  ;;  %v4728_v20 = vadd.f32 %v4352_v36, %v2194_v25 }
 0x1fb   : > { %3328 = vtanh.f32 %v2420_v28  ;;  %v2297_v5 = vmul.f32 0.044715, %v4715_v37  ;;  %v2196_v55 = vadd.f32 %v2164_v61, %v2132_v29  ;;  %v4733_v35 = vadd.f32 %v4352_v36, %v4231_v3 }
 0x1fc   : > { %v2423_v16 = vmul.f32 0.7978846, %v2391_v53  ;;  %v2259_v49 = vmul.f32 0.5, %v4645_v56  ;;  %v2422_v24 = vmul.f32 0.7978846, %v2390_v32  ;;  %v2134_v48 = vadd.f32 %v5139_v4, %v4212_v26  ;;  %v5143_v32 = vld [vmem:[#allocation36_spill] sm:$0xff] }
 0x1fd   : > { %v2296_v47 = vmul.f32 0.044715, %v4728_v20  ;;  %v4740_v52 = vmul.f32 0.5, %v4654_v40  ;;  %v2329_v7 = vmul.f32 %v2297_v5, %v4715_v37  ;;  %v4744_v31 = vadd.f32 %v4352_v36, %v2196_v55 }
 0x1fe   : > { %3330 = vtanh.f32 %v2423_v16  ;;  %v2299_v56 = vmul.f32 0.044715, %v4733_v35  ;;  %v2166_v51 = vsel %vm989_vm4, %v5140_v54, 0.0  ;;  %v2258_v26 = vmul.f32 0.5, %v4664_v50 }
 0x1ff   : > { %3332 = vtanh.f32 %v2422_v24  ;;  %v2328_v3 = vmul.f32 %v2296_v47, %v4728_v20  ;;  %v2361_v40 = vmul.f32 %v2329_v7, %v4715_v37  ;;  %v2298_v17 = vmul.f32 0.044715, %v4744_v31 }
 0x200   : > { %v2198_v44 = vadd.f32 %v2166_v51, %v2134_v48  ;;  %v2260_v27 = vmul.f32 0.5, %v4669_v41  ;;  %v2331_v12 = vmul.f32 %v2299_v56, %v4733_v35  ;;  %v4759_v19 = vadd.f32 %v4352_v36, %v5141_v62  ;;  %v5144_v51 = vld [vmem:[#allocation38_spill] sm:$0xff] }
 0x201   : > { %v3321_v9 = vpop.eup %3320  ;;  %v2360_v63 = vmul.f32 %v2328_v3, %v4728_v20  ;;  %v2393_v42 = vadd.f32 %v2361_v40, %v4715_v37  ;;  %v2330_v50 = vmul.f32 %v2298_v17, %v4744_v31  ;;  %v4767_v60 = vmul.f32 0.5, %v4676_v6 }
 0x202   : > { %v2481_v2 = vadd.f32 1.0, %v3321_v9  ;;  %v4764_v43 = vadd.f32 %v4352_v36, %v2198_v44  ;;  %v2363_v39 = vmul.f32 %v2331_v12, %v4733_v35  ;;  %v2301_v11 = vmul.f32 0.044715, %v4759_v19 }
 0x203   : > { %v2392_v41 = vadd.f32 %v2360_v63, %v4728_v20  ;;  %v3323_v15 = vpop.eup %3322  ;;  %v4774_v30 = vmul.f32 0.5, %v4692_v22  ;;  %v2425_v25 = vmul.f32 0.7978846, %v2393_v42  ;;  %v2362_v0 = vmul.f32 %v2330_v50, %v4744_v31 }
 0x204   : > { %v2513_v28 = vmul.f32 %v2481_v2, %v4697_v1  ;;  %v3325_v53 = vpop.eup %3324  ;;  %v2483_v57 = vadd.f32 1.0, %v3323_v15  ;;  %v2395_v6 = vadd.f32 %v2363_v39, %v4733_v35  ;;  %v2300_v29 = vmul.f32 0.044715, %v4764_v43  ;;  %v5142_v1 = vld [vmem:[#allocation37_spill] sm:$0xff]  ;;  %v5145_v2 = vld [vmem:[#allocation39_spill] sm:$0xff] }
 0x205   : > { %v2424_v21 = vmul.f32 0.7978846, %v2392_v41  ;;  %3334 = vtanh.f32 %v2425_v25  ;;  %v2394_v58 = vadd.f32 %v2362_v0, %v4744_v31  ;;  %v2333_v61 = vmul.f32 %v2301_v11, %v4759_v19  ;;  %v5146_v11 = vld [vmem:[#allocation41_spill] sm:$0xff] }
 0x206   : > { %3211 = vmatprep.mubr.f32.mxu1 %v2513_v28  ;;  %v2136_v22 = vadd.f32 %v5143_v32, %v5142_v1  ;;  %v3327_v16 = vpop.eup %3326  ;;  %v2485_v5 = vadd.f32 1.0, %v3325_v53  ;;  %v2427_v55 = vmul.f32 0.7978846, %v2395_v6  ;;  %v2332_v24 = vmul.f32 %v2300_v29, %v4764_v43  ;;  %v5147_v29 = vld [vmem:[#allocation44_spill] sm:$0xff] }
 0x207   : > { %3336 = vtanh.f32 %v2424_v21  ;;  %v2482_v4 = vadd.f32 1.0, %v3327_v16  ;;  %v2515_v48 = vmul.f32 %v2483_v57, %v2259_v49  ;;  %v2426_v7 = vmul.f32 0.7978846, %v2394_v58  ;;  %v5148_v58 = vld [vmem:[#allocation43_spill] sm:$0xff]  ;;  %v5150_v1 = vld [vmem:[#allocation8_spill] sm:$0xff] }
 0x208   : > { %v3329_v47 = vpop.eup %3328  ;;  %v2365_v3 = vmul.f32 %v2333_v61, %v4759_v19  ;;  %3338 = vtanh.f32 %v2427_v55  ;;  %v2364_v54 = vmul.f32 %v2332_v24, %v4764_v43  ;;  %v2168_v40 = vsel %vm989_vm4, %v5144_v51, 0.0  ;;  %v5149_v61 = vld [vmem:[#allocation42_spill] sm:$0xff] }
 0x209   : > { %v2484_v56 = vadd.f32 1.0, %v3329_v47  ;;  %v2514_v17 = vmul.f32 %v2482_v4, %v2258_v26  ;;  %3340 = vtanh.f32 %v2426_v7  ;;  %v2200_v9 = vadd.f32 %v2168_v40, %v2136_v22 }
 0x20a   : > { %v2397_v44 = vadd.f32 %v2365_v3, %v4759_v19  ;;  %v2265_v12 = vmul.f32 0.5, %v4715_v37  ;;  %v2396_v49 = vadd.f32 %v2364_v54, %v4764_v43  ;;  %v4794_v62 = vadd.f32 %v4352_v36, %v4340_v34 }
 0x20b   : > { %v3331_v63 = vpop.eup %3330  ;;  %v2138_v42 = vadd.f32 %v5145_v2, %v4320_v23  ;;  %3212 = vmatmul.mubr.f32.gmra.mxu1 %v2514_v17  ;;  %v2264_v26 = vmul.f32 0.5, %v4728_v20  ;;  %v4800_v39 = vadd.f32 %v4352_v36, %v2200_v9  ;;  %v2170_v37 = vsel %vm989_vm4, %v5146_v11, 0.0  ;;  %v5153_v11 = vld [vmem:[#allocation45_spill] sm:$0xff] }
 0x20c   : > { %v3333_v50 = vpop.eup %3332  ;;  %v2429_v41 = vmul.f32 0.7978846, %v2397_v44  ;;  %3214 = vmatprep.mubr.f32.mxu1 %v2515_v48  ;;  %v2517_v15 = vmul.f32 %v2485_v5, %v4740_v52  ;;  %v2487_v34 = vadd.f32 1.0, %v3331_v63  ;;  %v2428_v28 = vmul.f32 0.7978846, %v2396_v49  ;;  %v5151_v5 = vld [vmem:[#allocation46_spill] sm:$0xff] }
 0x20d   : > { %v2303_v25 = vmul.f32 0.044715, %v4794_v62  ;;  %v2516_v23 = vmul.f32 %v2484_v56, %v2260_v27  ;;  %v2486_v0 = vadd.f32 1.0, %v3333_v50  ;;  %v2302_v20 = vmul.f32 0.044715, %v4800_v39 }
 0x20e   : > { %3342 = vtanh.f32 %v2429_v41  ;;  %v2267_v53 = vmul.f32 0.5, %v4733_v35  ;;  %v2202_v21 = vadd.f32 %v2170_v37, %v2138_v42  ;;  %v4813_v52 = vadd.f32 %v4352_v36, %v5147_v29  ;;  %v5152_v41 = vld [vmem:[#allocation9_spill] sm:$0xff] }
 0x20f   : > { %3344 = vtanh.f32 %v2428_v28  ;;  %v2335_v57 = vmul.f32 %v2303_v25, %v4794_v62  ;;  %3215 = vmatmul.mubr.f32.gmra.mxu1 %v2516_v23  ;;  %v2334_v6 = vmul.f32 %v2302_v20, %v4800_v39  ;;  %v2140_v27 = vadd.f32 %v5149_v61, %v5148_v58 }
 0x210   : > { %v2172_v32 = vsel %vm989_vm4, %v5150_v1, 0.0  ;;  %3217 = vmatprep.mubr.f32.mxu1 %v2517_v15  ;;  %v2519_v35 = vmul.f32 %v2487_v34, %v4767_v60  ;;  %v4823_v16 = vadd.f32 %v4352_v36, %v2202_v21  ;;  %v4827_v55 = vadd.f32 %v4352_v36, %v5151_v5 }
 0x211   : > { %v2367_v22 = vmul.f32 %v2335_v57, %v4794_v62  ;;  %v2518_v24 = vmul.f32 %v2486_v0, %v4774_v30  ;;  %v2366_v47 = vmul.f32 %v2334_v6, %v4800_v39  ;;  %v2305_v4 = vmul.f32 0.044715, %v4813_v52  ;;  %v5154_v6 = vld [vmem:[#allocation13_spill] sm:$0xff] }
 0x212   : > { %v2204_v48 = vadd.f32 %v2172_v32, %v2140_v27  ;;  %v3335_v7 = vpop.eup %3334  ;;  %v2266_v3 = vmul.f32 0.5, %v4744_v31  ;;  %v2269_v60 = vmul.f32 0.5, %v4759_v19  ;;  %v2304_v54 = vmul.f32 0.044715, %v4823_v16 }
 0x213   : > { %v2399_v56 = vadd.f32 %v2367_v22, %v4794_v62  ;;  %3218 = vmatmul.mubr.f32.gmra.mxu1 %v2518_v24  ;;  %v2489_v40 = vadd.f32 1.0, %v3335_v7  ;;  %v2398_v17 = vadd.f32 %v2366_v47, %v4800_v39  ;;  %v2337_v30 = vmul.f32 %v2305_v4, %v4813_v52  ;;  %v5155_v22 = vld [vmem:[#allocation47_spill] sm:$0xff] }
 0x214   : > { %v3337_v51 = vpop.eup %3336  ;;  %v4839_v44 = vadd.f32 %v4352_v36, %v2204_v48  ;;  %3220 = vmatprep.mubr.f32.mxu1 %v2519_v35  ;;  %v2336_v31 = vmul.f32 %v2304_v54, %v4823_v16  ;;  %v2307_v19 = vmul.f32 0.044715, %v4827_v55  ;;  %v2142_v37 = vadd.f32 %v5153_v11, %v5152_v41 }
 0x215   : > { %v2488_v9 = vadd.f32 1.0, %v3337_v51  ;;  %v2431_v63 = vmul.f32 0.7978846, %v2399_v56  ;;  %v3339_v49 = vpop.eup %3338  ;;  %v2521_v2 = vmul.f32 %v2489_v40, %v2265_v12  ;;  %v2430_v42 = vmul.f32 0.7978846, %v2398_v17 }
 0x216   : > { %v2369_v50 = vmul.f32 %v2337_v30, %v4813_v52  ;;  %v3341_v15 = vpop.eup %3340  ;;  %v2491_v28 = vadd.f32 1.0, %v3339_v49  ;;  %v2368_v25 = vmul.f32 %v2336_v31, %v4823_v16  ;;  %v2306_v20 = vmul.f32 0.044715, %v4839_v44 }
 0x217   : > { %v2520_v34 = vmul.f32 %v2488_v9, %v2264_v26  ;;  %3346 = vtanh.f32 %v2431_v63  ;;  %v2490_v23 = vadd.f32 1.0, %v3341_v15  ;;  %v2339_v21 = vmul.f32 %v2307_v19, %v4827_v55 }
 0x218   : > { %3348 = vtanh.f32 %v2430_v42  ;;  %v2401_v0 = vadd.f32 %v2369_v50, %v4813_v52  ;;  %v2523_v12 = vmul.f32 %v2491_v28, %v2267_v53  ;;  %v2400_v57 = vadd.f32 %v2368_v25, %v4823_v16 }
 0x219   : > { %3221 = vmatmul.mubr.f32.gmra.mxu1 %v2520_v34  ;;  %v2174_v26 = vsel %vm989_vm4, %v5154_v6, 0.0  ;;  %v2522_v29 = vmul.f32 %v2490_v23, %v2266_v3  ;;  %v2338_v61 = vmul.f32 %v2306_v20, %v4839_v44  ;;  %v2371_v35 = vmul.f32 %v2339_v21, %v4827_v55 }
 0x21a   : > { %3223 = vmatprep.mubr.f32.mxu1 %v2521_v2  ;;  %v2433_v58 = vmul.f32 0.7978846, %v2401_v0  ;;  %v2206_v27 = vadd.f32 %v2174_v26, %v2142_v37  ;;  %v2432_v32 = vmul.f32 0.7978846, %v2400_v57  ;;  %v4858_v53 = vadd.f32 %v4352_v36, %v4571_v59 }
 0x21b   : > { %v3343_v1 = vpop.eup %3342  ;;  %v2144_v5 = vadd.f32 %v5155_v22, %v4564_v46  ;;  %v2370_v4 = vmul.f32 %v2338_v61, %v4839_v44  ;;  %v2268_v7 = vmul.f32 0.5, %v4764_v43  ;;  %v2403_v56 = vadd.f32 %v2371_v35, %v4827_v55 }
 0x21c   : > { %v3345_v24 = vpop.eup %3344  ;;  %v2493_v47 = vadd.f32 1.0, %v3343_v1  ;;  %3350 = vtanh.f32 %v2433_v58  ;;  %v4864_v48 = vadd.f32 %v4352_v36, %v2206_v27  ;;  %v2211_v59 = vadd.f32 %v4656_v14, %v4636_v45 }
 0x21d   : > { %3224 = vmatmul.mubr.f32.gmra.mxu1 %v2522_v29  ;;  %v2492_v3 = vadd.f32 1.0, %v3345_v24  ;;  %3352 = vtanh.f32 %v2432_v32  ;;  %v2402_v54 = vadd.f32 %v2370_v4, %v4839_v44  ;;  %v2435_v17 = vmul.f32 0.7978846, %v2403_v56 }
 0x21e   : > { %3226 = vmatprep.mubr.f32.mxu1 %v2523_v12  ;;  %v2525_v46 = vmul.f32 %v2493_v47, %v2269_v60  ;;  %v2308_v51 = vmul.f32 0.044715, %v4864_v48  ;;  %v2309_v30 = vmul.f32 0.044715, %v4858_v53  ;;  %v2176_v43 = vsel %vm989_vm4, %v4567_v18, 0.0 }
 0x21f   : > { %v2524_v40 = vmul.f32 %v2492_v3, %v2268_v7  ;;  %v2180_v9 = vsel %vm989_vm4, %v4638_v8, 0.0  ;;  %v2434_v63 = vmul.f32 0.7978846, %v2402_v54  ;;  %v2208_v14 = vadd.f32 %v2176_v43, %v2144_v5  ;;  %v3374_v7 = vld [vmem:[%s5057_s4] ss:$0 sm:$0xff] }
 0x220   : > { %v2340_v45 = vmul.f32 %v2308_v51, %v4864_v48  ;;  %3354 = vtanh.f32 %v2435_v17  ;;  %v2341_v60 = vmul.f32 %v2309_v30, %v4858_v53  ;;  %v2311_v31 = vmul.f32 0.044715, %v4724_v13 }
 0x221   : > { %3227 = vmatmul.mubr.f32.gmra.mxu1 %v2524_v40  ;;  %v4884_v19 = vadd.f32 %v4352_v36, %v4685_v10  ;;  %3356 = vtanh.f32 %v2434_v63  ;;  %v4888_v33 = vadd.f32 %v4352_v36, %v2208_v14  ;;  %v4891_v8 = vadd.f32 %v4352_v36, %v2211_v59 }
 0x222   : > { %3229 = vmatprep.mubr.f32.mxu1 %v2525_v46  ;;  %v2372_v18 = vmul.f32 %v2340_v45, %v4864_v48  ;;  %v2271_v49 = vmul.f32 0.5, %v4794_v62  ;;  %v2373_v2 = vmul.f32 %v2341_v60, %v4858_v53  ;;  %v2343_v42 = vmul.f32 %v2311_v31, %v4724_v13 }
 0x223   : > { %v2312_v50 = vmul.f32 0.044715, %v4884_v19  ;;  %v2270_v41 = vmul.f32 0.5, %v4800_v39  ;;  %v2273_v11 = vmul.f32 0.5, %v4813_v52  ;;  %v2310_v15 = vmul.f32 0.044715, %v4888_v33 }
 0x224   : > { %v3347_v10 = vpop.eup %3346  ;;  %v2404_v37 = vadd.f32 %v2372_v18, %v4864_v48  ;;  %v2405_v28 = vadd.f32 %v2373_v2, %v4858_v53  ;;  %v2375_v62 = vmul.f32 %v2343_v42, %v4724_v13  ;;  %v2313_v39 = vmul.f32 0.044715, %v4891_v8 }
 0x225   : > { %v3349_v34 = vpop.eup %3348  ;;  %v2495_v36 = vadd.f32 1.0, %v3347_v10  ;;  %v2344_v25 = vmul.f32 %v2312_v50, %v4884_v19  ;;  %v2342_v20 = vmul.f32 %v2310_v15, %v4888_v33  ;;  %v2212_v1 = vadd.f32 %v2180_v9, %v4679_v38 }
 0x226   : > { %v2494_v23 = vadd.f32 1.0, %v3349_v34  ;;  %v2436_v0 = vmul.f32 0.7978846, %v2404_v37  ;;  %v2437_v52 = vmul.f32 0.7978846, %v2405_v28  ;;  %v2407_v57 = vadd.f32 %v2375_v62, %v4724_v13 }
 0x227   : > { %v2527_v12 = vmul.f32 %v2495_v36, %v2271_v49  ;;  %v2376_v21 = vmul.f32 %v2344_v25, %v4884_v19  ;;  %v2374_v26 = vmul.f32 %v2342_v20, %v4888_v33  ;;  %v2345_v29 = vmul.f32 %v2313_v39, %v4891_v8 }
 0x228   : > { %v2526_v6 = vmul.f32 %v2494_v23, %v2270_v41  ;;  %3358 = vtanh.f32 %v2436_v0  ;;  %v2439_v61 = vmul.f32 0.7978846, %v2407_v57  ;;  %v2272_v35 = vmul.f32 0.5, %v4823_v16 }
 0x229   : > { %v3351_v58 = vpop.eup %3350  ;;  %3360 = vtanh.f32 %v2437_v52  ;;  %v2408_v27 = vadd.f32 %v2376_v21, %v4884_v19  ;;  %v2406_v5 = vadd.f32 %v2374_v26, %v4888_v33  ;;  %v2377_v24 = vmul.f32 %v2345_v29, %v4891_v8 }
 0x22a   : > { %v3353_v32 = vpop.eup %3352  ;;  %3230 = vmatmul.mubr.f32.gmra.mxu1 %v2526_v6  ;;  %v2497_v22 = vadd.f32 1.0, %v3351_v58  ;;  %3362 = vtanh.f32 %v2439_v61  ;;  %v2250_v3 = vadd.f32 %v3374_v7, %v2212_v1  ;;  %v2275_v17 = vmul.f32 0.5, %v4827_v55 }
 0x22b   : > { %3232 = vmatprep.mubr.f32.mxu1 %v2527_v12  ;;  %v2496_v47 = vadd.f32 1.0, %v3353_v32  ;;  %v2440_v4 = vmul.f32 0.7978846, %v2408_v27  ;;  %v2438_v38 = vmul.f32 0.7978846, %v2406_v5  ;;  %v2409_v59 = vadd.f32 %v2377_v24, %v4891_v8 }
 0x22c   : > { %v2529_v56 = vmul.f32 %v2497_v22, %v2273_v11  ;;  %v2314_v16 = vmul.f32 0.044715, %v2250_v3  ;;  %v2274_v9 = vmul.f32 0.5, %v4839_v44  ;;  %v2276_v42 = vmul.f32 0.5, %v4864_v48 }
 0x22d   : > { %v2528_v46 = vmul.f32 %v2496_v47, %v2272_v35  ;;  %3364 = vtanh.f32 %v2440_v4  ;;  %v3355_v54 = vpop.eup %3354  ;;  %v2441_v51 = vmul.f32 0.7978846, %v2409_v59  ;;  %v2277_v55 = vmul.f32 0.5, %v4858_v53 }
 0x22e   : > { %3366 = vtanh.f32 %v2438_v38  ;;  %v3357_v40 = vpop.eup %3356  ;;  %v2499_v30 = vadd.f32 1.0, %v3355_v54  ;;  %v2346_v43 = vmul.f32 %v2314_v16, %v2250_v3  ;;  %v2279_v36 = vmul.f32 0.5, %v4724_v13 }
 0x22f   : > { %3233 = vmatmul.mubr.f32.gmra.mxu1 %v2528_v46  ;;  %v2498_v63 = vadd.f32 1.0, %v3357_v40  ;;  %3368 = vtanh.f32 %v2441_v51  ;;  %v2278_v28 = vmul.f32 0.5, %v4888_v33  ;;  %v2281_v20 = vmul.f32 0.5, %v4891_v8  ;;  %v4932_v8 = vld [vmem:[%s5059_s6] ss:$0 sm:$0xff] }
 0x230   : > { %3235 = vmatprep.mubr.f32.mxu1 %v2529_v56  ;;  %v2531_v45 = vmul.f32 %v2499_v30, %v2275_v17  ;;  %v2378_v14 = vmul.f32 %v2346_v43, %v2250_v3  ;;  %v2280_v39 = vmul.f32 0.5, %v4884_v19  ;;  %v2282_v13 = vmul.f32 0.5, %v2250_v3 }
 0x231   : > { %v2530_v60 = vmul.f32 %v2498_v63, %v2274_v9 }
 0x232   : > { %v2410_v31 = vadd.f32 %v2378_v14, %v2250_v3 }
 0x233   : > { %3236 = vmatmul.mubr.f32.gmra.mxu1 %v2530_v60 }
 0x234   : > { %3238 = vmatprep.mubr.f32.mxu1 %v2531_v45  ;;  %v2442_v49 = vmul.f32 0.7978846, %v2410_v31 }
 0x235   : > { %v3359_v18 = vpop.eup %3358 }
 0x236   : > { %v3361_v2 = vpop.eup %3360  ;;  %v2500_v50 = vadd.f32 1.0, %v3359_v18  ;;  %3370 = vtanh.f32 %v2442_v49 }
 0x237   : > { %v2501_v10 = vadd.f32 1.0, %v3361_v2  ;;  %v3363_v41 = vpop.eup %3362 }
 0x238   : > { %v2532_v44 = vmul.f32 %v2500_v50, %v2276_v42  ;;  %v2503_v37 = vadd.f32 1.0, %v3363_v41 }
 0x239   : > { %v2533_v11 = vmul.f32 %v2501_v10, %v2277_v55 }
 0x23a   : > { %v3365_v15 = vpop.eup %3364  ;;  %3239 = vmatmul.mubr.f32.gmra.mxu1 %v2532_v44  ;;  %v2535_v48 = vmul.f32 %v2503_v37, %v2279_v36 }
 0x23b   : > { %v3367_v34 = vpop.eup %3366  ;;  %3241 = vmatprep.mubr.f32.mxu1 %v2533_v11  ;;  %v2504_v53 = vadd.f32 1.0, %v3365_v15 }
 0x23c   : > { %v2502_v62 = vadd.f32 1.0, %v3367_v34  ;;  %v3369_v25 = vpop.eup %3368 }
 0x23d   : > { %v2505_v0 = vadd.f32 1.0, %v3369_v25  ;;  %v2536_v52 = vmul.f32 %v2504_v53, %v2280_v39 }
 0x23e   : > { %v2534_v23 = vmul.f32 %v2502_v62, %v2278_v28 }
 0x23f   : > { %v2537_v12 = vmul.f32 %v2505_v0, %v2281_v20 }
 0x240   : > { %3242 = vmatmul.mubr.f32.gmra.mxu1 %v2534_v23 }
 0x241   : > { %3244 = vmatprep.mubr.f32.mxu1 %v2535_v48 }
 0x243   : > { %v3371_v57 = vpop.eup %3370 }
 0x244   : > { %3245 = vmatmul.mubr.f32.gmra.mxu1 %v2536_v52  ;;  %v2506_v33 = vadd.f32 1.0, %v3371_v57 }
 0x245   : > { %3247 = vmatprep.mubr.f32.mxu1 %v2537_v12 }
 0x246   : > { %v2538_v21 = vmul.f32 %v2506_v33, %v2282_v13 }
 0x248   : > { %3248 = vmatmul.mubr.f32.gmra.mxu1 %v2538_v21 }
 0x299   : > { %v3204_v19 = vpop.f32.mrf.mxu1 }
 0x29a   : > { %v2626_v6 = vadd.f32 %v3204_v19, %v4932_v8 }
 0x29b   : > { %v2620_v26 = vpop.f32.mrf.mxu1 }
 0x29c   : > { %2780 = vst.msk [vmem:[%s4937_s24 + $0x8] sm:$0xff] %vm380_vm0, %v2626_v6  ;;  %v2621_v29 = vadd.f32 %v4932_v8, %v2620_v26 }
 0x29e   : > { %2779 = vst.msk [vmem:[%s4937_s24] sm:$0xff] %vm380_vm0, %v2621_v29 }
 0x2a7   : > { %v3207_v58 = vpop.f32.mrf.mxu1 }
 0x2a8   : > { %v2636_v61 = vadd.f32 %v3207_v58, %v4932_v8 }
 0x2a9   : > { %v2630_v27 = vpop.f32.mrf.mxu1 }
 0x2aa   : > { %2782 = vst.msk [vmem:[%s4937_s24 + $0x18] sm:$0xff] %vm380_vm0, %v2636_v61  ;;  %v2631_v1 = vadd.f32 %v4932_v8, %v2630_v27 }
 0x2ac   : > { %2781 = vst.msk [vmem:[%s4937_s24 + $0x10] sm:$0xff] %vm380_vm0, %v2631_v1 }
 0x2b7   : > { %v3210_v32 = vpop.f32.mrf.mxu1 }
 0x2b8   : > { %v2646_v35 = vadd.f32 %v3210_v32, %v4932_v8 }
 0x2b9   : > { %v2640_v22 = vpop.f32.mrf.mxu1 }
 0x2ba   : > { %2784 = vst.msk [vmem:[%s4937_s24 + $0x28] sm:$0xff] %vm380_vm0, %v2646_v35  ;;  %v2641_v5 = vadd.f32 %v4932_v8, %v2640_v22 }
 0x2bc   : > { %2783 = vst.msk [vmem:[%s4937_s24 + $0x20] sm:$0xff] %vm380_vm0, %v2641_v5 }
 0x2cb   : > { %v3213_v24 = vpop.f32.mrf.mxu1 }
 0x2cc   : > { %v2656_v47 = vadd.f32 %v3213_v24, %v4932_v8 }
 0x2cd   : > { %v2650_v4 = vpop.f32.mrf.mxu1 }
 0x2ce   : > { %2786 = vst.msk [vmem:[%s4937_s24 + $0x38] sm:$0xff] %vm380_vm0, %v2656_v47  ;;  %v2651_v7 = vadd.f32 %v4932_v8, %v2650_v4 }
 0x2cf   : > { %v3216_v3 = vpop.f32.mrf.mxu1 }
 0x2d0   : > { %2785 = vst.msk [vmem:[%s4937_s24 + $0x30] sm:$0xff] %vm380_vm0, %v2651_v7  ;;  %v2666_v56 = vadd.f32 %v3216_v3, %v4932_v8 }
 0x2d1   : > { %v2660_v38 = vpop.f32.mrf.mxu1 }
 0x2d2   : > { %2788 = vst.msk [vmem:[%s4937_s24 + $0x48] sm:$0xff] %vm380_vm0, %v2666_v56  ;;  %v2661_v59 = vadd.f32 %v4932_v8, %v2660_v38 }
 0x2d3   : > { %v3219_v46 = vpop.f32.mrf.mxu1 }
 0x2d4   : > { %2787 = vst.msk [vmem:[%s4937_s24 + $0x40] sm:$0xff] %vm380_vm0, %v2661_v59  ;;  %v2676_v16 = vadd.f32 %v3219_v46, %v4932_v8 }
 0x2d5   : > { %v2670_v54 = vpop.f32.mrf.mxu1 }
 0x2d6   : > { %2790 = vst.msk [vmem:[%s4937_s24 + $0x58] sm:$0xff] %vm380_vm0, %v2676_v16  ;;  %v2671_v51 = vadd.f32 %v4932_v8, %v2670_v54 }
 0x2d8   : > { %2789 = vst.msk [vmem:[%s4937_s24 + $0x50] sm:$0xff] %vm380_vm0, %v2671_v51 }
 0x2d9   : > { %v3222_v40 = vpop.f32.mrf.mxu1 }
 0x2da   : > { %v2686_v17 = vadd.f32 %v3222_v40, %v4932_v8 }
 0x2db   : > { %v2680_v30 = vpop.f32.mrf.mxu1 }
 0x2dc   : > { %2792 = vst.msk [vmem:[%s4937_s24 + $0x68] sm:$0xff] %vm380_vm0, %v2686_v17  ;;  %v2681_v43 = vadd.f32 %v4932_v8, %v2680_v30 }
 0x2dd   : > { %v3225_v9 = vpop.f32.mrf.mxu1 }
 0x2de   : > { %2791 = vst.msk [vmem:[%s4937_s24 + $0x60] sm:$0xff] %vm380_vm0, %v2681_v43  ;;  %v2696_v63 = vadd.f32 %v3225_v9, %v4932_v8 }
 0x2df   : > { %v2690_v45 = vpop.f32.mrf.mxu1 }
 0x2e0   : > { %2794 = vst.msk [vmem:[%s4937_s24 + $0x78] sm:$0xff] %vm380_vm0, %v2696_v63  ;;  %v2691_v14 = vadd.f32 %v4932_v8, %v2690_v45 }
 0x2e1   : > { %v3228_v60 = vpop.f32.mrf.mxu1 }
 0x2e2   : > { %2793 = vst.msk [vmem:[%s4937_s24 + $0x70] sm:$0xff] %vm380_vm0, %v2691_v14  ;;  %v2706_v31 = vadd.f32 %v3228_v60, %v4932_v8 }
 0x2e3   : > { %v2700_v18 = vpop.f32.mrf.mxu1 }
 0x2e4   : > { %2796 = vst.msk [vmem:[%s4937_s24 + $0x88] sm:$0xff] %vm380_vm0, %v2706_v31  ;;  %v2701_v49 = vadd.f32 %v4932_v8, %v2700_v18 }
 0x2e6   : > { %2795 = vst.msk [vmem:[%s4937_s24 + $0x80] sm:$0xff] %vm380_vm0, %v2701_v49 }
 0x2ea   : > { %v3231_v2 = vpop.f32.mrf.mxu1 }
 0x2eb   : > { %v2716_v42 = vadd.f32 %v3231_v2, %v4932_v8 }
 0x2ec   : > { %v2710_v50 = vpop.f32.mrf.mxu1 }
 0x2ed   : > { %2798 = vst.msk [vmem:[%s4937_s24 + $0x98] sm:$0xff] %vm380_vm0, %v2716_v42  ;;  %v2711_v55 = vadd.f32 %v4932_v8, %v2710_v50 }
 0x2ef   : > { %2797 = vst.msk [vmem:[%s4937_s24 + $0x90] sm:$0xff] %vm380_vm0, %v2711_v55  ;;  %v3234_v10 = vpop.f32.mrf.mxu1 }
 0x2f0   : > { %v2726_v41 = vadd.f32 %v3234_v10, %v4932_v8 }
 0x2f1   : > { %v2720_v44 = vpop.f32.mrf.mxu1 }
 0x2f2   : > { %2800 = vst.msk [vmem:[%s4937_s24 + $0xa8] sm:$0xff] %vm380_vm0, %v2726_v41  ;;  %v2721_v11 = vadd.f32 %v4932_v8, %v2720_v44 }
 0x2f3   : > { %v3237_v37 = vpop.f32.mrf.mxu1 }
 0x2f4   : > { %2799 = vst.msk [vmem:[%s4937_s24 + $0xa0] sm:$0xff] %vm380_vm0, %v2721_v11  ;;  %v2736_v15 = vadd.f32 %v3237_v37, %v4932_v8 }
 0x2f5   : > { %v2730_v34 = vpop.f32.mrf.mxu1 }
 0x2f6   : > { %2802 = vst.msk [vmem:[%s4937_s24 + $0xb8] sm:$0xff] %vm380_vm0, %v2736_v15  ;;  %v2731_v36 = vadd.f32 %v4932_v8, %v2730_v34 }
 0x2f8   : > { %2801 = vst.msk [vmem:[%s4937_s24 + $0xb0] sm:$0xff] %vm380_vm0, %v2731_v36 }
 0x2fa   : > { %v3240_v28 = vpop.f32.mrf.mxu1 }
 0x2fb   : > { %v2746_v62 = vadd.f32 %v3240_v28, %v4932_v8 }
 0x2fc   : > { %v2740_v25 = vpop.f32.mrf.mxu1 }
 0x2fd   : > { %2804 = vst.msk [vmem:[%s4937_s24 + $0xc8] sm:$0xff] %vm380_vm0, %v2746_v62  ;;  %v2741_v48 = vadd.f32 %v4932_v8, %v2740_v25 }
 0x2ff   : > { %2803 = vst.msk [vmem:[%s4937_s24 + $0xc0] sm:$0xff] %vm380_vm0, %v2741_v48 }
 0x300   : > { %v3243_v23 = vpop.f32.mrf.mxu1 }
 0x301   : > { %v2756_v53 = vadd.f32 %v3243_v23, %v4932_v8 }
 0x302   : > { %v2750_v0 = vpop.f32.mrf.mxu1 }
 0x303   : > { %2806 = vst.msk [vmem:[%s4937_s24 + $0xd8] sm:$0xff] %vm380_vm0, %v2756_v53  ;;  %v2751_v20 = vadd.f32 %v4932_v8, %v2750_v0 }
 0x304   : > { %v3246_v39 = vpop.f32.mrf.mxu1 }
 0x305   : > { %2805 = vst.msk [vmem:[%s4937_s24 + $0xd0] sm:$0xff] %vm380_vm0, %v2751_v20  ;;  %v2766_v12 = vadd.f32 %v3246_v39, %v4932_v8 }
 0x306   : > { %v2760_v52 = vpop.f32.mrf.mxu1 }
 0x307   : > { %2808 = vst.msk [vmem:[%s4937_s24 + $0xe8] sm:$0xff] %vm380_vm0, %v2766_v12  ;;  %v2761_v57 = vadd.f32 %v4932_v8, %v2760_v52 }
 0x308   : > { %v3249_v13 = vpop.f32.mrf.mxu1 }
 0x309   : > { %2807 = vst.msk [vmem:[%s4937_s24 + $0xe0] sm:$0xff] %vm380_vm0, %v2761_v57  ;;  %v2776_v33 = vadd.f32 %v3249_v13, %v4932_v8 }
 0x30a   : > { %v2770_v21 = vpop.f32.mrf.mxu1 }
 0x30b   : > { %2810 = vst.msk [vmem:[%s4937_s24 + $0xf8] sm:$0xff] %vm380_vm0, %v2776_v33  ;;  %v2771_v19 = vadd.f32 %v4932_v8, %v2770_v21 }
 0x30d   : > { %2809 = vst.msk [vmem:[%s4937_s24 + $0xf0] sm:$0xff] %vm380_vm0, %v2771_v19 }
 0x30e PF: > { %s20_s29 = sadd.s32 1, %s3453_s29   ;;  %s5156_s24 = smov %s3437_s25 }
 0x30f   : > { %p17_p8 = scmp.ge.s32.totalorder %s20_s29, 4   ;;  %s5157_s25 = smov %s3441_s26 }
 0x310   : > { %s5158_s26 = smov %s3548_s13  ;;  %s5159_s27 = smov %s3449_s28 }
 0x311   : > { %s5160_s28 = smov %s5162_s8  ;;  %19 = sbr.rel (!%p17_p8) target bundleno = 4 (0x4), region = 111 }
 0x316   :  { %2841 = vsyncpa [#allocation4], 1 }
 0x317   :  { %2843 = vsyncpa [#allocation4 + $0x1], 1 }

</bundles_post_ra>
